<compile_context>
chip_gen: v7x
topology: tpu7x:2x2x1
jax: 0.10.0
libtpu: 0.0.40
codegen_flags: <defaults>
</compile_context>

<pallas_src>
import math

import jax
import jax.numpy as jnp
from jax import lax
from jax.experimental import pallas as pl
from jax.experimental.pallas import tpu as pltpu  # noqa: F401  (TPU backend assumed)

# ---- small config consistent with the module's __init__ ----
HIDDEN = 32          # hidden_size
N_HEADS = 4          # attention_head_num
D_HEAD = 8           # attention_head_size (N_HEADS * D_HEAD == HIDDEN)
INTER = 64           # intermediate_size
SEQ = 8              # current segment length
MEM = 8              # memory length
KLEN = MEM + SEQ     # key length (16)
RPAD = KLEN + SEQ    # rel emb padded length (24); shift never reads past row 22
BATCH = 2
N_LAYERS = 2
LN_EPS = 1e-5
NEG_INF = -1e30
SCALE = 1.0 / math.sqrt(D_HEAD)

# packed-parameter geometry
QKVR = 4 * HIDDEN            # 128 : fused q|k|v|r projection width (head-flattened)
WA_ROWS = HIDDEN + 8         # 40  : rows 0:32 weights, row 32 biases, rows 33:40 pad
W2_ROW = HIDDEN + 8          # 40  : w2 starts at a sublane-aligned row
WF_ROWS = W2_ROW + INTER     # 104


def txl_block_kernel(cat_ref, mask_ref, rel_ref, wa_ref, wf_ref, vp_ref, out_ref):
    f32 = jnp.float32

    # ---- packed parameters (static, tile-friendly slices) ----
    w_qkvr = wa_ref[0:HIDDEN, 0:QKVR]                        # [32, 128]
    w_o    = wa_ref[0:HIDDEN, QKVR:QKVR + HIDDEN]            # [32, 32]
    b_qkvr = wa_ref[HIDDEN:HIDDEN + 1, 0:QKVR]               # [1, 128]
    b_o    = wa_ref[HIDDEN:HIDDEN + 1, QKVR:QKVR + HIDDEN]   # [1, 32]

    w1 = wf_ref[0:HIDDEN, :]                                 # [32, 64]
    b1 = wf_ref[HIDDEN:HIDDEN + 1, :]                        # [1, 64]
    w2 = wf_ref[W2_ROW:W2_ROW + INTER, 0:HIDDEN]             # [64, 32]

    u_f  = vp_ref[0:1, :]                                    # [1, 32] (head-flattened u)
    vb_f = vp_ref[1:2, :]                                    # [1, 32] (head-flattened v bias)
    g1 = vp_ref[2:3, :]; be1 = vp_ref[3:4, :]
    g2 = vp_ref[4:5, :]; be2 = vp_ref[5:6, :]
    b2 = vp_ref[6:7, :]

    cat2 = cat_ref[...]                                      # [B*KLEN, 32]  (mem||x, both batches)
    rel  = rel_ref[...]                                      # [RPAD, 32]
    addmask = jnp.where(mask_ref[...] > 0.0, 0.0, NEG_INF)   # [SEQ, KLEN] additive mask

    # ---- fused projections: q|k|v for every token of both batches, r for rel-pos ----
    qkv = jnp.dot(cat2, w_qkvr, preferred_element_type=f32) + b_qkvr   # [32, 128]
    rp  = jnp.dot(rel,  w_qkvr, preferred_element_type=f32) + b_qkvr   # [24, 128]
    r_all = rp[:, 3 * HIDDEN:4 * HIDDEN]                               # [24, 32]

    attn_rows = []
    for b in range(BATCH):                                   # unrolled, 2 iterations
        row0 = b * KLEN
        q_b = qkv[row0 + MEM:row0 + KLEN, 0:HIDDEN]          # [8, 32]  (current segment only)
        k_b = qkv[row0:row0 + KLEN, HIDDEN:2 * HIDDEN]       # [16, 32]
        v_b = qkv[row0:row0 + KLEN, 2 * HIDDEN:3 * HIDDEN]   # [16, 32]
        qu_b = (q_b + u_f) * SCALE                           # content stream: u + scale folded
        qv_b = (q_b + vb_f) * SCALE                          # position stream: v + scale folded

        ctx = []
        for h in range(N_HEADS):                             # unrolled, 4 iterations
            sl = slice(h * D_HEAD, (h + 1) * D_HEAD)
            ac = lax.dot_general(qu_b[:, sl], k_b[:, sl], (((1,), (1,)), ((), ())),
                                 preferred_element_type=f32)            # [8, 16]
            bdr = lax.dot_general(qv_b[:, sl], r_all[:, sl], (((1,), (1,)), ((), ())),
                                  preferred_element_type=f32)           # [8, 24]
            # Transformer-XL relative shift: bd[i, j] = bdr[i, j + SEQ-1-i]
            # TODO(synk): could be one pltpu.roll(bdr, shift, axis=1, stride=1, stride_axis=0);
            # kept as static slices for guaranteed shift semantics.
            bd = jnp.concatenate(
                [bdr[i:i + 1, SEQ - 1 - i:SEQ - 1 - i + KLEN] for i in range(SEQ)], axis=0)
            s = ac + bd + addmask
            m = jnp.max(s, axis=-1, keepdims=True)
            e = jnp.exp(s - m)
            p = e * pl.reciprocal(jnp.sum(e, axis=-1, keepdims=True), approx=True)
            ctx.append(jnp.dot(p, v_b[:, sl], preferred_element_type=f32))   # [8, 8]

        ctx_b = jnp.concatenate(ctx, axis=1)                               # [8, 32]
        attn_rows.append(jnp.dot(ctx_b, w_o, preferred_element_type=f32))  # [8, 32]

    attn = jnp.concatenate(attn_rows, axis=0) + b_o                        # [16, 32]
    x_all = jnp.concatenate(
        [cat2[b * KLEN + MEM:(b + 1) * KLEN, :] for b in range(BATCH)], axis=0)  # [16, 32]

    # residual + LayerNorm 1
    y1 = x_all + attn
    mu1 = jnp.mean(y1, axis=-1, keepdims=True)
    var1 = jnp.mean((y1 - mu1) ** 2, axis=-1, keepdims=True)
    z1 = (y1 - mu1) * lax.rsqrt(var1 + LN_EPS) * g1 + be1

    # FeedForward (Linear -> GELU -> Linear)
    # TODO(synk): tanh-approx GELU used; PyTorch nn.GELU default is the exact erf form.
    h1 = jnp.dot(z1, w1, preferred_element_type=f32) + b1
    h1 = jax.nn.gelu(h1, approximate=True)
    ff = jnp.dot(h1, w2, preferred_element_type=f32) + b2

    # residual + LayerNorm 2
    y2 = z1 + ff
    mu2 = jnp.mean(y2, axis=-1, keepdims=True)
    var2 = jnp.mean((y2 - mu2) ** 2, axis=-1, keepdims=True)
    out_ref[...] = (y2 - mu2) * lax.rsqrt(var2 + LN_EPS) * g2 + be2


def pack_params(params):
    """Pack 24 small parameter arrays into 3 contiguous, tile-friendly arrays."""
    flat_w = lambda w: jnp.transpose(w, (1, 0, 2)).reshape(HIDDEN, N_HEADS * D_HEAD)
    flat_b = lambda b: b.reshape(-1)

    w_qkvr = jnp.concatenate([flat_w(params["wq"]), flat_w(params["wk"]),
                              flat_w(params["wv"]), flat_w(params["wr"])], axis=1)  # [32,128]
    b_qkvr = jnp.concatenate([flat_b(params["bq"]), flat_b(params["bk"]),
                              flat_b(params["bv"]), flat_b(params["br"])], axis=0)  # [128]

    w_attn = jnp.zeros((WA_ROWS, QKVR + HIDDEN), jnp.float32)                        # [40,160]
    w_attn = w_attn.at[0:HIDDEN, 0:QKVR].set(w_qkvr)
    w_attn = w_attn.at[0:HIDDEN, QKVR:QKVR + HIDDEN].set(
        params["wo"].reshape(N_HEADS * D_HEAD, HIDDEN))
    w_attn = w_attn.at[HIDDEN, 0:QKVR].set(b_qkvr)
    w_attn = w_attn.at[HIDDEN, QKVR:QKVR + HIDDEN].set(flat_b(params["bo"]))

    w_ffn = jnp.zeros((WF_ROWS, INTER), jnp.float32)                                 # [104,64]
    w_ffn = w_ffn.at[0:HIDDEN, :].set(params["w1"])
    w_ffn = w_ffn.at[HIDDEN, :].set(flat_b(params["b1"]))
    w_ffn = w_ffn.at[W2_ROW:W2_ROW + INTER, 0:HIDDEN].set(params["w2"])

    vec = jnp.stack([flat_b(params["u"]), flat_b(params["vb"]),
                     flat_b(params["g1"]), flat_b(params["be1"]),
                     flat_b(params["g2"]), flat_b(params["be2"]),
                     flat_b(params["b2"]), jnp.zeros((HIDDEN,), jnp.float32)], axis=0)  # [8,32]
    return w_attn, w_ffn, vec


def txl_block_pallas(x, rel_pos_emb, attention_mask, memories, layer_num, segments_num, params):
    del segments_num  # TODO(synk): partial-segment memory handling not modeled.
    mem = memories[layer_num]                                          # [B, MEM, H]
    cat = jnp.concatenate([mem, x], axis=1)                            # [B, KLEN, H] (data movement)
    cat2 = cat.reshape(BATCH * KLEN, HIDDEN)
    rel_pad = jnp.concatenate(
        [rel_pos_emb, jnp.zeros((RPAD - KLEN, HIDDEN), rel_pos_emb.dtype)], axis=0)  # [24, H]
    w_attn, w_ffn, vec = pack_params(params)

    out2 = pl.pallas_call(
        txl_block_kernel,
        out_shape=jax.ShapeDtypeStruct((BATCH * SEQ, HIDDEN), jnp.float32),
    )(cat2, attention_mask, rel_pad, w_attn, w_ffn, vec)
    out = out2.reshape(BATCH, SEQ, HIDDEN)

    # Transformer-XL memory update (pure data movement -> plain JAX glue)
    new_mem = cat[:, -MEM:, :]
    new_memories = memories.at[layer_num].set(lax.stop_gradient(new_mem))
    return out, new_memories


# ---------------- pure-JAX reference (same math, for a sanity check) ----------------
def _ln(y, g, b):
    mu = jnp.mean(y, axis=-1, keepdims=True)
    var = jnp.mean((y - mu) ** 2, axis=-1, keepdims=True)
    return (y - mu) * lax.rsqrt(var + LN_EPS) * g + b


def txl_block_ref(x, rel_pos_emb, attention_mask, memories, layer_num, params):
    mem = memories[layer_num]
    rel_pad = jnp.concatenate(
        [rel_pos_emb, jnp.zeros((RPAD - KLEN, HIDDEN), rel_pos_emb.dtype)], axis=0)
    outs = []
    for b in range(BATCH):
        xb, memb = x[b], mem[b]
        cat = jnp.concatenate([memb, xb], axis=0)
        acc = jnp.zeros((SEQ, HIDDEN), jnp.float32)
        for h in range(N_HEADS):
            q = xb @ params["wq"][h] + params["bq"][h]
            k = cat @ params["wk"][h] + params["bk"][h]
            v = cat @ params["wv"][h] + params["bv"][h]
            r = rel_pad @ params["wr"][h] + params["br"][h]
            ac = (q + params["u"][h]) @ k.T
            bd_raw = (q + params["vb"][h]) @ r.T
            bd = jnp.stack(
                [bd_raw[i, SEQ - 1 - i: SEQ - 1 - i + KLEN] for i in range(SEQ)], axis=0)
            s = (ac + bd) * SCALE
            s = jnp.where(attention_mask > 0.0, s, NEG_INF)
            p = jax.nn.softmax(s, axis=-1)
            acc = acc + (p @ v) @ params["wo"][h]
        attn = acc + params["bo"]
        z1 = _ln(xb + attn, params["g1"], params["be1"])
        ff = jax.nn.gelu(z1 @ params["w1"] + params["b1"],
                         approximate=True) @ params["w2"] + params["b2"]
        outs.append(_ln(z1 + ff, params["g2"], params["be2"]))
    out = jnp.stack(outs, axis=0)
    new_mem = jnp.concatenate([mem, x], axis=1)[:, -MEM:, :]
    return out, memories.at[layer_num].set(new_mem)


def init_params(key):
    ks = jax.random.split(key, 20)
    w = lambda k, s, sc=0.05: (sc * jax.random.normal(k, s)).astype(jnp.float32)
    return {
        "wq": w(ks[0], (N_HEADS, HIDDEN, D_HEAD)), "bq": w(ks[1], (N_HEADS, 1, D_HEAD)),
        "wk": w(ks[2], (N_HEADS, HIDDEN, D_HEAD)), "bk": w(ks[3], (N_HEADS, 1, D_HEAD)),
        "wv": w(ks[4], (N_HEADS, HIDDEN, D_HEAD)), "bv": w(ks[5], (N_HEADS, 1, D_HEAD)),
        "wr": w(ks[6], (N_HEADS, HIDDEN, D_HEAD)), "br": w(ks[7], (N_HEADS, 1, D_HEAD)),
        "u": w(ks[8], (N_HEADS, 1, D_HEAD)), "vb": w(ks[9], (N_HEADS, 1, D_HEAD)),
        "wo": w(ks[10], (N_HEADS, D_HEAD, HIDDEN)), "bo": w(ks[11], (1, HIDDEN)),
        "g1": jnp.ones((1, HIDDEN), jnp.float32), "be1": jnp.zeros((1, HIDDEN), jnp.float32),
        "w1": w(ks[12], (HIDDEN, INTER)), "b1": w(ks[13], (1, INTER)),
        "w2": w(ks[14], (INTER, HIDDEN)), "b2": w(ks[15], (1, HIDDEN)),
        "g2": jnp.ones((1, HIDDEN), jnp.float32), "be2": jnp.zeros((1, HIDDEN), jnp.float32),
    }


if __name__ == "__main__":
    key = jax.random.PRNGKey(0)
    kx, km, kr, kp = jax.random.split(key, 4)
    x = jax.random.normal(kx, (BATCH, SEQ, HIDDEN), jnp.float32)
    memories = jax.random.normal(km, (N_LAYERS, BATCH, MEM, HIDDEN), jnp.float32)
    rel_pos_emb = jax.random.normal(kr, (KLEN, HIDDEN), jnp.float32)
    # causal + memory mask: query i may attend to keys j <= MEM + i
    attention_mask = (jnp.arange(KLEN)[None, :] <= (MEM + jnp.arange(SEQ))[:, None]).astype(jnp.float32)
    params = init_params(kp)
    layer_num, segments_num = 0, 2

    out, new_memories = txl_block_pallas(x, rel_pos_emb, attention_mask, memories,
                                         layer_num, segments_num, params)
    jax.block_until_ready((out, new_memories))

    ref_out, ref_mem = txl_block_ref(x, rel_pos_emb, attention_mask, memories, layer_num, params)
    assert out.shape == (BATCH, SEQ, HIDDEN)
    assert jnp.allclose(out, ref_out, atol=2e-2, rtol=2e-2), float(jnp.max(jnp.abs(out - ref_out)))
    assert jnp.allclose(new_memories, ref_mem)
    print("KERNEL_OK")
</pallas_src>

<mosaic_0001>
module attributes {stable_mosaic.version = 11 : i64} {
  func.func @txl_block_kernel(%arg0: memref<32x32xf32, #tpu.memory_space<vmem>>, %arg1: memref<8x16xf32, #tpu.memory_space<vmem>>, %arg2: memref<24x32xf32, #tpu.memory_space<vmem>>, %arg3: memref<40x160xf32, #tpu.memory_space<vmem>>, %arg4: memref<104x64xf32, #tpu.memory_space<vmem>>, %arg5: memref<8x32xf32, #tpu.memory_space<vmem>>, %arg6: memref<16x32xf32, #tpu.memory_space<vmem>>) attributes {dimension_semantics = [], scalar_prefetch = 0 : i64, scratch_operands = 0 : i64, tpu.core_type = #tpu.core_type<tc>} {
    %c0 = arith.constant 0 : index
    %c0_0 = arith.constant 0 : index
    %0 = vector.load %arg3[%c0, %c0_0] : memref<40x160xf32, #tpu.memory_space<vmem>>, vector<32x128xf32>
    %c0_1 = arith.constant 0 : index
    %c128 = arith.constant 128 : index
    %1 = vector.load %arg3[%c0_1, %c128] : memref<40x160xf32, #tpu.memory_space<vmem>>, vector<32x32xf32>
    %c32 = arith.constant 32 : index
    %c0_2 = arith.constant 0 : index
    %2 = vector.load %arg3[%c32, %c0_2] : memref<40x160xf32, #tpu.memory_space<vmem>>, vector<1x128xf32>
    %c32_3 = arith.constant 32 : index
    %c128_4 = arith.constant 128 : index
    %3 = vector.load %arg3[%c32_3, %c128_4] : memref<40x160xf32, #tpu.memory_space<vmem>>, vector<1x32xf32>
    %c0_5 = arith.constant 0 : index
    %c0_6 = arith.constant 0 : index
    %4 = vector.load %arg4[%c0_5, %c0_6] : memref<104x64xf32, #tpu.memory_space<vmem>>, vector<32x64xf32>
    %c32_7 = arith.constant 32 : index
    %c0_8 = arith.constant 0 : index
    %5 = vector.load %arg4[%c32_7, %c0_8] : memref<104x64xf32, #tpu.memory_space<vmem>>, vector<1x64xf32>
    %c40 = arith.constant 40 : index
    %c0_9 = arith.constant 0 : index
    %6 = vector.load %arg4[%c40, %c0_9] : memref<104x64xf32, #tpu.memory_space<vmem>>, vector<64x32xf32>
    %c0_10 = arith.constant 0 : index
    %c0_11 = arith.constant 0 : index
    %7 = vector.load %arg5[%c0_10, %c0_11] : memref<8x32xf32, #tpu.memory_space<vmem>>, vector<1x32xf32>
    %c1 = arith.constant 1 : index
    %c0_12 = arith.constant 0 : index
    %8 = vector.load %arg5[%c1, %c0_12] : memref<8x32xf32, #tpu.memory_space<vmem>>, vector<1x32xf32>
    %c2 = arith.constant 2 : index
    %c0_13 = arith.constant 0 : index
    %9 = vector.load %arg5[%c2, %c0_13] : memref<8x32xf32, #tpu.memory_space<vmem>>, vector<1x32xf32>
    %c3 = arith.constant 3 : index
    %c0_14 = arith.constant 0 : index
    %10 = vector.load %arg5[%c3, %c0_14] : memref<8x32xf32, #tpu.memory_space<vmem>>, vector<1x32xf32>
    %c4 = arith.constant 4 : index
    %c0_15 = arith.constant 0 : index
    %11 = vector.load %arg5[%c4, %c0_15] : memref<8x32xf32, #tpu.memory_space<vmem>>, vector<1x32xf32>
    %c5 = arith.constant 5 : index
    %c0_16 = arith.constant 0 : index
    %12 = vector.load %arg5[%c5, %c0_16] : memref<8x32xf32, #tpu.memory_space<vmem>>, vector<1x32xf32>
    %c6 = arith.constant 6 : index
    %c0_17 = arith.constant 0 : index
    %13 = vector.load %arg5[%c6, %c0_17] : memref<8x32xf32, #tpu.memory_space<vmem>>, vector<1x32xf32>
    %c0_18 = arith.constant 0 : index
    %c0_19 = arith.constant 0 : index
    %14 = vector.load %arg0[%c0_18, %c0_19] : memref<32x32xf32, #tpu.memory_space<vmem>>, vector<32x32xf32>
    %c0_20 = arith.constant 0 : index
    %c0_21 = arith.constant 0 : index
    %15 = vector.load %arg2[%c0_20, %c0_21] : memref<24x32xf32, #tpu.memory_space<vmem>>, vector<24x32xf32>
    %c0_22 = arith.constant 0 : index
    %c0_23 = arith.constant 0 : index
    %16 = vector.load %arg1[%c0_22, %c0_23] : memref<8x16xf32, #tpu.memory_space<vmem>>, vector<8x16xf32>
    %cst = arith.constant 0.000000e+00 : f32
    %17 = vector.broadcast %cst : f32 to vector<8x16xf32>
    %18 = arith.cmpf ogt, %16, %17 : vector<8x16xf32>
    %cst_24 = arith.constant 0.000000e+00 : f32
    %cst_25 = arith.constant -1.000000e+30 : f32
    %19 = vector.broadcast %cst_24 : f32 to vector<8x16xf32>
    %20 = vector.broadcast %cst_25 : f32 to vector<8x16xf32>
    %21 = arith.select %18, %19, %20 : vector<8x16xi1>, vector<8x16xf32>
    %cst_26 = arith.constant dense<0.000000e+00> : vector<32x128xf32>
    %22 = tpu.matmul %14, %0, %cst_26 {dimension_numbers = #tpu.dot_dimension_numbers<[1], [0], [0], [1], [0, 0, 1, 1], [], []>} : vector<32x32xf32>, vector<32x128xf32>, vector<32x128xf32> -> vector<32x128xf32>
    %23 = vector.broadcast %2 : vector<1x128xf32> to vector<32x128xf32>
    %24 = arith.addf %22, %23 : vector<32x128xf32>
    %cst_27 = arith.constant dense<0.000000e+00> : vector<24x128xf32>
    %25 = tpu.matmul %15, %0, %cst_27 {dimension_numbers = #tpu.dot_dimension_numbers<[1], [0], [0], [1], [0, 0, 1, 1], [], []>} : vector<24x32xf32>, vector<32x128xf32>, vector<24x128xf32> -> vector<24x128xf32>
    %26 = vector.broadcast %2 : vector<1x128xf32> to vector<24x128xf32>
    %27 = arith.addf %25, %26 : vector<24x128xf32>
    %28 = vector.extract_strided_slice %27 {offsets = [0, 96], sizes = [24, 32], strides = [1, 1]} : vector<24x128xf32> to vector<24x32xf32>
    %29 = vector.extract_strided_slice %24 {offsets = [8, 0], sizes = [8, 32], strides = [1, 1]} : vector<32x128xf32> to vector<8x32xf32>
    %30 = vector.extract_strided_slice %24 {offsets = [0, 32], sizes = [16, 32], strides = [1, 1]} : vector<32x128xf32> to vector<16x32xf32>
    %31 = vector.extract_strided_slice %24 {offsets = [0, 64], sizes = [16, 32], strides = [1, 1]} : vector<32x128xf32> to vector<16x32xf32>
    %32 = vector.broadcast %7 : vector<1x32xf32> to vector<8x32xf32>
    %33 = arith.addf %29, %32 : vector<8x32xf32>
    %cst_28 = arith.constant 0.353553385 : f32
    %34 = vector.broadcast %cst_28 : f32 to vector<8x32xf32>
    %35 = arith.mulf %33, %34 : vector<8x32xf32>
    %36 = vector.broadcast %8 : vector<1x32xf32> to vector<8x32xf32>
    %37 = arith.addf %29, %36 : vector<8x32xf32>
    %cst_29 = arith.constant 0.353553385 : f32
    %38 = vector.broadcast %cst_29 : f32 to vector<8x32xf32>
    %39 = arith.mulf %37, %38 : vector<8x32xf32>
    %40 = vector.extract_strided_slice %35 {offsets = [0, 0], sizes = [8, 8], strides = [1, 1]} : vector<8x32xf32> to vector<8x8xf32>
    %41 = vector.extract_strided_slice %30 {offsets = [0, 0], sizes = [16, 8], strides = [1, 1]} : vector<16x32xf32> to vector<16x8xf32>
    %cst_30 = arith.constant dense<0.000000e+00> : vector<8x16xf32>
    %42 = tpu.matmul %40, %41, %cst_30 {dimension_numbers = #tpu.dot_dimension_numbers<[1], [1], [0], [0], [0, 0, 1, 0], [], []>} : vector<8x8xf32>, vector<16x8xf32>, vector<8x16xf32> -> vector<8x16xf32>
    %43 = vector.extract_strided_slice %39 {offsets = [0, 0], sizes = [8, 8], strides = [1, 1]} : vector<8x32xf32> to vector<8x8xf32>
    %44 = vector.extract_strided_slice %28 {offsets = [0, 0], sizes = [24, 8], strides = [1, 1]} : vector<24x32xf32> to vector<24x8xf32>
    %cst_31 = arith.constant dense<0.000000e+00> : vector<8x24xf32>
    %45 = tpu.matmul %43, %44, %cst_31 {dimension_numbers = #tpu.dot_dimension_numbers<[1], [1], [0], [0], [0, 0, 1, 0], [], []>} : vector<8x8xf32>, vector<24x8xf32>, vector<8x24xf32> -> vector<8x24xf32>
    %46 = vector.extract_strided_slice %45 {offsets = [0, 7], sizes = [1, 16], strides = [1, 1]} : vector<8x24xf32> to vector<1x16xf32>
    %47 = vector.extract_strided_slice %45 {offsets = [1, 6], sizes = [1, 16], strides = [1, 1]} : vector<8x24xf32> to vector<1x16xf32>
    %48 = vector.extract_strided_slice %45 {offsets = [2, 5], sizes = [1, 16], strides = [1, 1]} : vector<8x24xf32> to vector<1x16xf32>
    %49 = vector.extract_strided_slice %45 {offsets = [3, 4], sizes = [1, 16], strides = [1, 1]} : vector<8x24xf32> to vector<1x16xf32>
    %50 = vector.extract_strided_slice %45 {offsets = [4, 3], sizes = [1, 16], strides = [1, 1]} : vector<8x24xf32> to vector<1x16xf32>
    %51 = vector.extract_strided_slice %45 {offsets = [5, 2], sizes = [1, 16], strides = [1, 1]} : vector<8x24xf32> to vector<1x16xf32>
    %52 = vector.extract_strided_slice %45 {offsets = [6, 1], sizes = [1, 16], strides = [1, 1]} : vector<8x24xf32> to vector<1x16xf32>
    %53 = vector.extract_strided_slice %45 {offsets = [7, 0], sizes = [1, 16], strides = [1, 1]} : vector<8x24xf32> to vector<1x16xf32>
    %54 = tpu.concatenate %46, %47, %48, %49, %50, %51, %52, %53 in 0 : vector<1x16xf32>, vector<1x16xf32>, vector<1x16xf32>, vector<1x16xf32>, vector<1x16xf32>, vector<1x16xf32>, vector<1x16xf32>, vector<1x16xf32> -> vector<8x16xf32>
    %55 = arith.addf %42, %54 : vector<8x16xf32>
    %56 = arith.addf %55, %21 : vector<8x16xf32>
    %cst_32 = arith.constant dense<0xFF800000> : vector<8xf32>
    %57 = vector.multi_reduction <maximumf>, %56, %cst_32 [1] : vector<8x16xf32> to vector<8xf32>
    %58 = vector.shape_cast %57 : vector<8xf32> to vector<8x1xf32>
    %59 = vector.broadcast %58 : vector<8x1xf32> to vector<8x16xf32>
    %60 = arith.subf %56, %59 : vector<8x16xf32>
    %61 = math.exp %60 : vector<8x16xf32>
    %cst_33 = arith.constant dense<0.000000e+00> : vector<8xf32>
    %62 = vector.multi_reduction <add>, %61, %cst_33 [1] : vector<8x16xf32> to vector<8xf32>
    %63 = vector.shape_cast %62 : vector<8xf32> to vector<8x1xf32>
    %64 = tpu.reciprocal %63 {approx = true} : vector<8x1xf32> -> vector<8x1xf32>
    %65 = vector.broadcast %64 : vector<8x1xf32> to vector<8x16xf32>
    %66 = arith.mulf %61, %65 : vector<8x16xf32>
    %67 = vector.extract_strided_slice %31 {offsets = [0, 0], sizes = [16, 8], strides = [1, 1]} : vector<16x32xf32> to vector<16x8xf32>
    %cst_34 = arith.constant dense<0.000000e+00> : vector<8x8xf32>
    %68 = tpu.matmul %66, %67, %cst_34 {dimension_numbers = #tpu.dot_dimension_numbers<[1], [0], [0], [1], [0, 0, 1, 1], [], []>} : vector<8x16xf32>, vector<16x8xf32>, vector<8x8xf32> -> vector<8x8xf32>
    %69 = vector.extract_strided_slice %35 {offsets = [0, 8], sizes = [8, 8], strides = [1, 1]} : vector<8x32xf32> to vector<8x8xf32>
    %70 = vector.extract_strided_slice %30 {offsets = [0, 8], sizes = [16, 8], strides = [1, 1]} : vector<16x32xf32> to vector<16x8xf32>
    %cst_35 = arith.constant dense<0.000000e+00> : vector<8x16xf32>
    %71 = tpu.matmul %69, %70, %cst_35 {dimension_numbers = #tpu.dot_dimension_numbers<[1], [1], [0], [0], [0, 0, 1, 0], [], []>} : vector<8x8xf32>, vector<16x8xf32>, vector<8x16xf32> -> vector<8x16xf32>
    %72 = vector.extract_strided_slice %39 {offsets = [0, 8], sizes = [8, 8], strides = [1, 1]} : vector<8x32xf32> to vector<8x8xf32>
    %73 = vector.extract_strided_slice %28 {offsets = [0, 8], sizes = [24, 8], strides = [1, 1]} : vector<24x32xf32> to vector<24x8xf32>
    %cst_36 = arith.constant dense<0.000000e+00> : vector<8x24xf32>
    %74 = tpu.matmul %72, %73, %cst_36 {dimension_numbers = #tpu.dot_dimension_numbers<[1], [1], [0], [0], [0, 0, 1, 0], [], []>} : vector<8x8xf32>, vector<24x8xf32>, vector<8x24xf32> -> vector<8x24xf32>
    %75 = vector.extract_strided_slice %74 {offsets = [0, 7], sizes = [1, 16], strides = [1, 1]} : vector<8x24xf32> to vector<1x16xf32>
    %76 = vector.extract_strided_slice %74 {offsets = [1, 6], sizes = [1, 16], strides = [1, 1]} : vector<8x24xf32> to vector<1x16xf32>
    %77 = vector.extract_strided_slice %74 {offsets = [2, 5], sizes = [1, 16], strides = [1, 1]} : vector<8x24xf32> to vector<1x16xf32>
    %78 = vector.extract_strided_slice %74 {offsets = [3, 4], sizes = [1, 16], strides = [1, 1]} : vector<8x24xf32> to vector<1x16xf32>
    %79 = vector.extract_strided_slice %74 {offsets = [4, 3], sizes = [1, 16], strides = [1, 1]} : vector<8x24xf32> to vector<1x16xf32>
    %80 = vector.extract_strided_slice %74 {offsets = [5, 2], sizes = [1, 16], strides = [1, 1]} : vector<8x24xf32> to vector<1x16xf32>
    %81 = vector.extract_strided_slice %74 {offsets = [6, 1], sizes = [1, 16], strides = [1, 1]} : vector<8x24xf32> to vector<1x16xf32>
    %82 = vector.extract_strided_slice %74 {offsets = [7, 0], sizes = [1, 16], strides = [1, 1]} : vector<8x24xf32> to vector<1x16xf32>
    %83 = tpu.concatenate %75, %76, %77, %78, %79, %80, %81, %82 in 0 : vector<1x16xf32>, vector<1x16xf32>, vector<1x16xf32>, vector<1x16xf32>, vector<1x16xf32>, vector<1x16xf32>, vector<1x16xf32>, vector<1x16xf32> -> vector<8x16xf32>
    %84 = arith.addf %71, %83 : vector<8x16xf32>
    %85 = arith.addf %84, %21 : vector<8x16xf32>
    %cst_37 = arith.constant dense<0xFF800000> : vector<8xf32>
    %86 = vector.multi_reduction <maximumf>, %85, %cst_37 [1] : vector<8x16xf32> to vector<8xf32>
    %87 = vector.shape_cast %86 : vector<8xf32> to vector<8x1xf32>
    %88 = vector.broadcast %87 : vector<8x1xf32> to vector<8x16xf32>
    %89 = arith.subf %85, %88 : vector<8x16xf32>
    %90 = math.exp %89 : vector<8x16xf32>
    %cst_38 = arith.constant dense<0.000000e+00> : vector<8xf32>
    %91 = vector.multi_reduction <add>, %90, %cst_38 [1] : vector<8x16xf32> to vector<8xf32>
    %92 = vector.shape_cast %91 : vector<8xf32> to vector<8x1xf32>
    %93 = tpu.reciprocal %92 {approx = true} : vector<8x1xf32> -> vector<8x1xf32>
    %94 = vector.broadcast %93 : vector<8x1xf32> to vector<8x16xf32>
    %95 = arith.mulf %90, %94 : vector<8x16xf32>
    %96 = vector.extract_strided_slice %31 {offsets = [0, 8], sizes = [16, 8], strides = [1, 1]} : vector<16x32xf32> to vector<16x8xf32>
    %cst_39 = arith.constant dense<0.000000e+00> : vector<8x8xf32>
    %97 = tpu.matmul %95, %96, %cst_39 {dimension_numbers = #tpu.dot_dimension_numbers<[1], [0], [0], [1], [0, 0, 1, 1], [], []>} : vector<8x16xf32>, vector<16x8xf32>, vector<8x8xf32> -> vector<8x8xf32>
    %98 = vector.extract_strided_slice %35 {offsets = [0, 16], sizes = [8, 8], strides = [1, 1]} : vector<8x32xf32> to vector<8x8xf32>
    %99 = vector.extract_strided_slice %30 {offsets = [0, 16], sizes = [16, 8], strides = [1, 1]} : vector<16x32xf32> to vector<16x8xf32>
    %cst_40 = arith.constant dense<0.000000e+00> : vector<8x16xf32>
    %100 = tpu.matmul %98, %99, %cst_40 {dimension_numbers = #tpu.dot_dimension_numbers<[1], [1], [0], [0], [0, 0, 1, 0], [], []>} : vector<8x8xf32>, vector<16x8xf32>, vector<8x16xf32> -> vector<8x16xf32>
    %101 = vector.extract_strided_slice %39 {offsets = [0, 16], sizes = [8, 8], strides = [1, 1]} : vector<8x32xf32> to vector<8x8xf32>
    %102 = vector.extract_strided_slice %28 {offsets = [0, 16], sizes = [24, 8], strides = [1, 1]} : vector<24x32xf32> to vector<24x8xf32>
    %cst_41 = arith.constant dense<0.000000e+00> : vector<8x24xf32>
    %103 = tpu.matmul %101, %102, %cst_41 {dimension_numbers = #tpu.dot_dimension_numbers<[1], [1], [0], [0], [0, 0, 1, 0], [], []>} : vector<8x8xf32>, vector<24x8xf32>, vector<8x24xf32> -> vector<8x24xf32>
    %104 = vector.extract_strided_slice %103 {offsets = [0, 7], sizes = [1, 16], strides = [1, 1]} : vector<8x24xf32> to vector<1x16xf32>
    %105 = vector.extract_strided_slice %103 {offsets = [1, 6], sizes = [1, 16], strides = [1, 1]} : vector<8x24xf32> to vector<1x16xf32>
    %106 = vector.extract_strided_slice %103 {offsets = [2, 5], sizes = [1, 16], strides = [1, 1]} : vector<8x24xf32> to vector<1x16xf32>
    %107 = vector.extract_strided_slice %103 {offsets = [3, 4], sizes = [1, 16], strides = [1, 1]} : vector<8x24xf32> to vector<1x16xf32>
    %108 = vector.extract_strided_slice %103 {offsets = [4, 3], sizes = [1, 16], strides = [1, 1]} : vector<8x24xf32> to vector<1x16xf32>
    %109 = vector.extract_strided_slice %103 {offsets = [5, 2], sizes = [1, 16], strides = [1, 1]} : vector<8x24xf32> to vector<1x16xf32>
    %110 = vector.extract_strided_slice %103 {offsets = [6, 1], sizes = [1, 16], strides = [1, 1]} : vector<8x24xf32> to vector<1x16xf32>
    %111 = vector.extract_strided_slice %103 {offsets = [7, 0], sizes = [1, 16], strides = [1, 1]} : vector<8x24xf32> to vector<1x16xf32>
    %112 = tpu.concatenate %104, %105, %106, %107, %108, %109, %110, %111 in 0 : vector<1x16xf32>, vector<1x16xf32>, vector<1x16xf32>, vector<1x16xf32>, vector<1x16xf32>, vector<1x16xf32>, vector<1x16xf32>, vector<1x16xf32> -> vector<8x16xf32>
    %113 = arith.addf %100, %112 : vector<8x16xf32>
    %114 = arith.addf %113, %21 : vector<8x16xf32>
    %cst_42 = arith.constant dense<0xFF800000> : vector<8xf32>
    %115 = vector.multi_reduction <maximumf>, %114, %cst_42 [1] : vector<8x16xf32> to vector<8xf32>
    %116 = vector.shape_cast %115 : vector<8xf32> to vector<8x1xf32>
    %117 = vector.broadcast %116 : vector<8x1xf32> to vector<8x16xf32>
    %118 = arith.subf %114, %117 : vector<8x16xf32>
    %119 = math.exp %118 : vector<8x16xf32>
    %cst_43 = arith.constant dense<0.000000e+00> : vector<8xf32>
    %120 = vector.multi_reduction <add>, %119, %cst_43 [1] : vector<8x16xf32> to vector<8xf32>
    %121 = vector.shape_cast %120 : vector<8xf32> to vector<8x1xf32>
    %122 = tpu.reciprocal %121 {approx = true} : vector<8x1xf32> -> vector<8x1xf32>
    %123 = vector.broadcast %122 : vector<8x1xf32> to vector<8x16xf32>
    %124 = arith.mulf %119, %123 : vector<8x16xf32>
    %125 = vector.extract_strided_slice %31 {offsets = [0, 16], sizes = [16, 8], strides = [1, 1]} : vector<16x32xf32> to vector<16x8xf32>
    %cst_44 = arith.constant dense<0.000000e+00> : vector<8x8xf32>
    %126 = tpu.matmul %124, %125, %cst_44 {dimension_numbers = #tpu.dot_dimension_numbers<[1], [0], [0], [1], [0, 0, 1, 1], [], []>} : vector<8x16xf32>, vector<16x8xf32>, vector<8x8xf32> -> vector<8x8xf32>
    %127 = vector.extract_strided_slice %35 {offsets = [0, 24], sizes = [8, 8], strides = [1, 1]} : vector<8x32xf32> to vector<8x8xf32>
    %128 = vector.extract_strided_slice %30 {offsets = [0, 24], sizes = [16, 8], strides = [1, 1]} : vector<16x32xf32> to vector<16x8xf32>
    %cst_45 = arith.constant dense<0.000000e+00> : vector<8x16xf32>
    %129 = tpu.matmul %127, %128, %cst_45 {dimension_numbers = #tpu.dot_dimension_numbers<[1], [1], [0], [0], [0, 0, 1, 0], [], []>} : vector<8x8xf32>, vector<16x8xf32>, vector<8x16xf32> -> vector<8x16xf32>
    %130 = vector.extract_strided_slice %39 {offsets = [0, 24], sizes = [8, 8], strides = [1, 1]} : vector<8x32xf32> to vector<8x8xf32>
    %131 = vector.extract_strided_slice %28 {offsets = [0, 24], sizes = [24, 8], strides = [1, 1]} : vector<24x32xf32> to vector<24x8xf32>
    %cst_46 = arith.constant dense<0.000000e+00> : vector<8x24xf32>
    %132 = tpu.matmul %130, %131, %cst_46 {dimension_numbers = #tpu.dot_dimension_numbers<[1], [1], [0], [0], [0, 0, 1, 0], [], []>} : vector<8x8xf32>, vector<24x8xf32>, vector<8x24xf32> -> vector<8x24xf32>
    %133 = vector.extract_strided_slice %132 {offsets = [0, 7], sizes = [1, 16], strides = [1, 1]} : vector<8x24xf32> to vector<1x16xf32>
    %134 = vector.extract_strided_slice %132 {offsets = [1, 6], sizes = [1, 16], strides = [1, 1]} : vector<8x24xf32> to vector<1x16xf32>
    %135 = vector.extract_strided_slice %132 {offsets = [2, 5], sizes = [1, 16], strides = [1, 1]} : vector<8x24xf32> to vector<1x16xf32>
    %136 = vector.extract_strided_slice %132 {offsets = [3, 4], sizes = [1, 16], strides = [1, 1]} : vector<8x24xf32> to vector<1x16xf32>
    %137 = vector.extract_strided_slice %132 {offsets = [4, 3], sizes = [1, 16], strides = [1, 1]} : vector<8x24xf32> to vector<1x16xf32>
    %138 = vector.extract_strided_slice %132 {offsets = [5, 2], sizes = [1, 16], strides = [1, 1]} : vector<8x24xf32> to vector<1x16xf32>
    %139 = vector.extract_strided_slice %132 {offsets = [6, 1], sizes = [1, 16], strides = [1, 1]} : vector<8x24xf32> to vector<1x16xf32>
    %140 = vector.extract_strided_slice %132 {offsets = [7, 0], sizes = [1, 16], strides = [1, 1]} : vector<8x24xf32> to vector<1x16xf32>
    %141 = tpu.concatenate %133, %134, %135, %136, %137, %138, %139, %140 in 0 : vector<1x16xf32>, vector<1x16xf32>, vector<1x16xf32>, vector<1x16xf32>, vector<1x16xf32>, vector<1x16xf32>, vector<1x16xf32>, vector<1x16xf32> -> vector<8x16xf32>
    %142 = arith.addf %129, %141 : vector<8x16xf32>
    %143 = arith.addf %142, %21 : vector<8x16xf32>
    %cst_47 = arith.constant dense<0xFF800000> : vector<8xf32>
    %144 = vector.multi_reduction <maximumf>, %143, %cst_47 [1] : vector<8x16xf32> to vector<8xf32>
    %145 = vector.shape_cast %144 : vector<8xf32> to vector<8x1xf32>
    %146 = vector.broadcast %145 : vector<8x1xf32> to vector<8x16xf32>
    %147 = arith.subf %143, %146 : vector<8x16xf32>
    %148 = math.exp %147 : vector<8x16xf32>
    %cst_48 = arith.constant dense<0.000000e+00> : vector<8xf32>
    %149 = vector.multi_reduction <add>, %148, %cst_48 [1] : vector<8x16xf32> to vector<8xf32>
    %150 = vector.shape_cast %149 : vector<8xf32> to vector<8x1xf32>
    %151 = tpu.reciprocal %150 {approx = true} : vector<8x1xf32> -> vector<8x1xf32>
    %152 = vector.broadcast %151 : vector<8x1xf32> to vector<8x16xf32>
    %153 = arith.mulf %148, %152 : vector<8x16xf32>
    %154 = vector.extract_strided_slice %31 {offsets = [0, 24], sizes = [16, 8], strides = [1, 1]} : vector<16x32xf32> to vector<16x8xf32>
    %cst_49 = arith.constant dense<0.000000e+00> : vector<8x8xf32>
    %155 = tpu.matmul %153, %154, %cst_49 {dimension_numbers = #tpu.dot_dimension_numbers<[1], [0], [0], [1], [0, 0, 1, 1], [], []>} : vector<8x16xf32>, vector<16x8xf32>, vector<8x8xf32> -> vector<8x8xf32>
    %156 = tpu.concatenate %68, %97, %126, %155 in 1 : vector<8x8xf32>, vector<8x8xf32>, vector<8x8xf32>, vector<8x8xf32> -> vector<8x32xf32>
    %cst_50 = arith.constant dense<0.000000e+00> : vector<8x32xf32>
    %157 = tpu.matmul %156, %1, %cst_50 {dimension_numbers = #tpu.dot_dimension_numbers<[1], [0], [0], [1], [0, 0, 1, 1], [], []>} : vector<8x32xf32>, vector<32x32xf32>, vector<8x32xf32> -> vector<8x32xf32>
    %158 = vector.extract_strided_slice %24 {offsets = [24, 0], sizes = [8, 32], strides = [1, 1]} : vector<32x128xf32> to vector<8x32xf32>
    %159 = vector.extract_strided_slice %24 {offsets = [16, 32], sizes = [16, 32], strides = [1, 1]} : vector<32x128xf32> to vector<16x32xf32>
    %160 = vector.extract_strided_slice %24 {offsets = [16, 64], sizes = [16, 32], strides = [1, 1]} : vector<32x128xf32> to vector<16x32xf32>
    %161 = vector.broadcast %7 : vector<1x32xf32> to vector<8x32xf32>
    %162 = arith.addf %158, %161 : vector<8x32xf32>
    %cst_51 = arith.constant 0.353553385 : f32
    %163 = vector.broadcast %cst_51 : f32 to vector<8x32xf32>
    %164 = arith.mulf %162, %163 : vector<8x32xf32>
    %165 = vector.broadcast %8 : vector<1x32xf32> to vector<8x32xf32>
    %166 = arith.addf %158, %165 : vector<8x32xf32>
    %cst_52 = arith.constant 0.353553385 : f32
    %167 = vector.broadcast %cst_52 : f32 to vector<8x32xf32>
    %168 = arith.mulf %166, %167 : vector<8x32xf32>
    %169 = vector.extract_strided_slice %164 {offsets = [0, 0], sizes = [8, 8], strides = [1, 1]} : vector<8x32xf32> to vector<8x8xf32>
    %170 = vector.extract_strided_slice %159 {offsets = [0, 0], sizes = [16, 8], strides = [1, 1]} : vector<16x32xf32> to vector<16x8xf32>
    %cst_53 = arith.constant dense<0.000000e+00> : vector<8x16xf32>
    %171 = tpu.matmul %169, %170, %cst_53 {dimension_numbers = #tpu.dot_dimension_numbers<[1], [1], [0], [0], [0, 0, 1, 0], [], []>} : vector<8x8xf32>, vector<16x8xf32>, vector<8x16xf32> -> vector<8x16xf32>
    %172 = vector.extract_strided_slice %168 {offsets = [0, 0], sizes = [8, 8], strides = [1, 1]} : vector<8x32xf32> to vector<8x8xf32>
    %173 = vector.extract_strided_slice %28 {offsets = [0, 0], sizes = [24, 8], strides = [1, 1]} : vector<24x32xf32> to vector<24x8xf32>
    %cst_54 = arith.constant dense<0.000000e+00> : vector<8x24xf32>
    %174 = tpu.matmul %172, %173, %cst_54 {dimension_numbers = #tpu.dot_dimension_numbers<[1], [1], [0], [0], [0, 0, 1, 0], [], []>} : vector<8x8xf32>, vector<24x8xf32>, vector<8x24xf32> -> vector<8x24xf32>
    %175 = vector.extract_strided_slice %174 {offsets = [0, 7], sizes = [1, 16], strides = [1, 1]} : vector<8x24xf32> to vector<1x16xf32>
    %176 = vector.extract_strided_slice %174 {offsets = [1, 6], sizes = [1, 16], strides = [1, 1]} : vector<8x24xf32> to vector<1x16xf32>
    %177 = vector.extract_strided_slice %174 {offsets = [2, 5], sizes = [1, 16], strides = [1, 1]} : vector<8x24xf32> to vector<1x16xf32>
    %178 = vector.extract_strided_slice %174 {offsets = [3, 4], sizes = [1, 16], strides = [1, 1]} : vector<8x24xf32> to vector<1x16xf32>
    %179 = vector.extract_strided_slice %174 {offsets = [4, 3], sizes = [1, 16], strides = [1, 1]} : vector<8x24xf32> to vector<1x16xf32>
    %180 = vector.extract_strided_slice %174 {offsets = [5, 2], sizes = [1, 16], strides = [1, 1]} : vector<8x24xf32> to vector<1x16xf32>
    %181 = vector.extract_strided_slice %174 {offsets = [6, 1], sizes = [1, 16], strides = [1, 1]} : vector<8x24xf32> to vector<1x16xf32>
    %182 = vector.extract_strided_slice %174 {offsets = [7, 0], sizes = [1, 16], strides = [1, 1]} : vector<8x24xf32> to vector<1x16xf32>
    %183 = tpu.concatenate %175, %176, %177, %178, %179, %180, %181, %182 in 0 : vector<1x16xf32>, vector<1x16xf32>, vector<1x16xf32>, vector<1x16xf32>, vector<1x16xf32>, vector<1x16xf32>, vector<1x16xf32>, vector<1x16xf32> -> vector<8x16xf32>
    %184 = arith.addf %171, %183 : vector<8x16xf32>
    %185 = arith.addf %184, %21 : vector<8x16xf32>
    %cst_55 = arith.constant dense<0xFF800000> : vector<8xf32>
    %186 = vector.multi_reduction <maximumf>, %185, %cst_55 [1] : vector<8x16xf32> to vector<8xf32>
    %187 = vector.shape_cast %186 : vector<8xf32> to vector<8x1xf32>
    %188 = vector.broadcast %187 : vector<8x1xf32> to vector<8x16xf32>
    %189 = arith.subf %185, %188 : vector<8x16xf32>
    %190 = math.exp %189 : vector<8x16xf32>
    %cst_56 = arith.constant dense<0.000000e+00> : vector<8xf32>
    %191 = vector.multi_reduction <add>, %190, %cst_56 [1] : vector<8x16xf32> to vector<8xf32>
    %192 = vector.shape_cast %191 : vector<8xf32> to vector<8x1xf32>
    %193 = tpu.reciprocal %192 {approx = true} : vector<8x1xf32> -> vector<8x1xf32>
    %194 = vector.broadcast %193 : vector<8x1xf32> to vector<8x16xf32>
    %195 = arith.mulf %190, %194 : vector<8x16xf32>
    %196 = vector.extract_strided_slice %160 {offsets = [0, 0], sizes = [16, 8], strides = [1, 1]} : vector<16x32xf32> to vector<16x8xf32>
    %cst_57 = arith.constant dense<0.000000e+00> : vector<8x8xf32>
    %197 = tpu.matmul %195, %196, %cst_57 {dimension_numbers = #tpu.dot_dimension_numbers<[1], [0], [0], [1], [0, 0, 1, 1], [], []>} : vector<8x16xf32>, vector<16x8xf32>, vector<8x8xf32> -> vector<8x8xf32>
    %198 = vector.extract_strided_slice %164 {offsets = [0, 8], sizes = [8, 8], strides = [1, 1]} : vector<8x32xf32> to vector<8x8xf32>
    %199 = vector.extract_strided_slice %159 {offsets = [0, 8], sizes = [16, 8], strides = [1, 1]} : vector<16x32xf32> to vector<16x8xf32>
    %cst_58 = arith.constant dense<0.000000e+00> : vector<8x16xf32>
    %200 = tpu.matmul %198, %199, %cst_58 {dimension_numbers = #tpu.dot_dimension_numbers<[1], [1], [0], [0], [0, 0, 1, 0], [], []>} : vector<8x8xf32>, vector<16x8xf32>, vector<8x16xf32> -> vector<8x16xf32>
    %201 = vector.extract_strided_slice %168 {offsets = [0, 8], sizes = [8, 8], strides = [1, 1]} : vector<8x32xf32> to vector<8x8xf32>
    %202 = vector.extract_strided_slice %28 {offsets = [0, 8], sizes = [24, 8], strides = [1, 1]} : vector<24x32xf32> to vector<24x8xf32>
    %cst_59 = arith.constant dense<0.000000e+00> : vector<8x24xf32>
    %203 = tpu.matmul %201, %202, %cst_59 {dimension_numbers = #tpu.dot_dimension_numbers<[1], [1], [0], [0], [0, 0, 1, 0], [], []>} : vector<8x8xf32>, vector<24x8xf32>, vector<8x24xf32> -> vector<8x24xf32>
    %204 = vector.extract_strided_slice %203 {offsets = [0, 7], sizes = [1, 16], strides = [1, 1]} : vector<8x24xf32> to vector<1x16xf32>
    %205 = vector.extract_strided_slice %203 {offsets = [1, 6], sizes = [1, 16], strides = [1, 1]} : vector<8x24xf32> to vector<1x16xf32>
    %206 = vector.extract_strided_slice %203 {offsets = [2, 5], sizes = [1, 16], strides = [1, 1]} : vector<8x24xf32> to vector<1x16xf32>
    %207 = vector.extract_strided_slice %203 {offsets = [3, 4], sizes = [1, 16], strides = [1, 1]} : vector<8x24xf32> to vector<1x16xf32>
    %208 = vector.extract_strided_slice %203 {offsets = [4, 3], sizes = [1, 16], strides = [1, 1]} : vector<8x24xf32> to vector<1x16xf32>
    %209 = vector.extract_strided_slice %203 {offsets = [5, 2], sizes = [1, 16], strides = [1, 1]} : vector<8x24xf32> to vector<1x16xf32>
    %210 = vector.extract_strided_slice %203 {offsets = [6, 1], sizes = [1, 16], strides = [1, 1]} : vector<8x24xf32> to vector<1x16xf32>
    %211 = vector.extract_strided_slice %203 {offsets = [7, 0], sizes = [1, 16], strides = [1, 1]} : vector<8x24xf32> to vector<1x16xf32>
    %212 = tpu.concatenate %204, %205, %206, %207, %208, %209, %210, %211 in 0 : vector<1x16xf32>, vector<1x16xf32>, vector<1x16xf32>, vector<1x16xf32>, vector<1x16xf32>, vector<1x16xf32>, vector<1x16xf32>, vector<1x16xf32> -> vector<8x16xf32>
    %213 = arith.addf %200, %212 : vector<8x16xf32>
    %214 = arith.addf %213, %21 : vector<8x16xf32>
    %cst_60 = arith.constant dense<0xFF800000> : vector<8xf32>
    %215 = vector.multi_reduction <maximumf>, %214, %cst_60 [1] : vector<8x16xf32> to vector<8xf32>
    %216 = vector.shape_cast %215 : vector<8xf32> to vector<8x1xf32>
    %217 = vector.broadcast %216 : vector<8x1xf32> to vector<8x16xf32>
    %218 = arith.subf %214, %217 : vector<8x16xf32>
    %219 = math.exp %218 : vector<8x16xf32>
    %cst_61 = arith.constant dense<0.000000e+00> : vector<8xf32>
    %220 = vector.multi_reduction <add>, %219, %cst_61 [1] : vector<8x16xf32> to vector<8xf32>
    %221 = vector.shape_cast %220 : vector<8xf32> to vector<8x1xf32>
    %222 = tpu.reciprocal %221 {approx = true} : vector<8x1xf32> -> vector<8x1xf32>
    %223 = vector.broadcast %222 : vector<8x1xf32> to vector<8x16xf32>
    %224 = arith.mulf %219, %223 : vector<8x16xf32>
    %225 = vector.extract_strided_slice %160 {offsets = [0, 8], sizes = [16, 8], strides = [1, 1]} : vector<16x32xf32> to vector<16x8xf32>
    %cst_62 = arith.constant dense<0.000000e+00> : vector<8x8xf32>
    %226 = tpu.matmul %224, %225, %cst_62 {dimension_numbers = #tpu.dot_dimension_numbers<[1], [0], [0], [1], [0, 0, 1, 1], [], []>} : vector<8x16xf32>, vector<16x8xf32>, vector<8x8xf32> -> vector<8x8xf32>
    %227 = vector.extract_strided_slice %164 {offsets = [0, 16], sizes = [8, 8], strides = [1, 1]} : vector<8x32xf32> to vector<8x8xf32>
    %228 = vector.extract_strided_slice %159 {offsets = [0, 16], sizes = [16, 8], strides = [1, 1]} : vector<16x32xf32> to vector<16x8xf32>
    %cst_63 = arith.constant dense<0.000000e+00> : vector<8x16xf32>
    %229 = tpu.matmul %227, %228, %cst_63 {dimension_numbers = #tpu.dot_dimension_numbers<[1], [1], [0], [0], [0, 0, 1, 0], [], []>} : vector<8x8xf32>, vector<16x8xf32>, vector<8x16xf32> -> vector<8x16xf32>
    %230 = vector.extract_strided_slice %168 {offsets = [0, 16], sizes = [8, 8], strides = [1, 1]} : vector<8x32xf32> to vector<8x8xf32>
    %231 = vector.extract_strided_slice %28 {offsets = [0, 16], sizes = [24, 8], strides = [1, 1]} : vector<24x32xf32> to vector<24x8xf32>
    %cst_64 = arith.constant dense<0.000000e+00> : vector<8x24xf32>
    %232 = tpu.matmul %230, %231, %cst_64 {dimension_numbers = #tpu.dot_dimension_numbers<[1], [1], [0], [0], [0, 0, 1, 0], [], []>} : vector<8x8xf32>, vector<24x8xf32>, vector<8x24xf32> -> vector<8x24xf32>
    %233 = vector.extract_strided_slice %232 {offsets = [0, 7], sizes = [1, 16], strides = [1, 1]} : vector<8x24xf32> to vector<1x16xf32>
    %234 = vector.extract_strided_slice %232 {offsets = [1, 6], sizes = [1, 16], strides = [1, 1]} : vector<8x24xf32> to vector<1x16xf32>
    %235 = vector.extract_strided_slice %232 {offsets = [2, 5], sizes = [1, 16], strides = [1, 1]} : vector<8x24xf32> to vector<1x16xf32>
    %236 = vector.extract_strided_slice %232 {offsets = [3, 4], sizes = [1, 16], strides = [1, 1]} : vector<8x24xf32> to vector<1x16xf32>
    %237 = vector.extract_strided_slice %232 {offsets = [4, 3], sizes = [1, 16], strides = [1, 1]} : vector<8x24xf32> to vector<1x16xf32>
    %238 = vector.extract_strided_slice %232 {offsets = [5, 2], sizes = [1, 16], strides = [1, 1]} : vector<8x24xf32> to vector<1x16xf32>
    %239 = vector.extract_strided_slice %232 {offsets = [6, 1], sizes = [1, 16], strides = [1, 1]} : vector<8x24xf32> to vector<1x16xf32>
    %240 = vector.extract_strided_slice %232 {offsets = [7, 0], sizes = [1, 16], strides = [1, 1]} : vector<8x24xf32> to vector<1x16xf32>
    %241 = tpu.concatenate %233, %234, %235, %236, %237, %238, %239, %240 in 0 : vector<1x16xf32>, vector<1x16xf32>, vector<1x16xf32>, vector<1x16xf32>, vector<1x16xf32>, vector<1x16xf32>, vector<1x16xf32>, vector<1x16xf32> -> vector<8x16xf32>
    %242 = arith.addf %229, %241 : vector<8x16xf32>
    %243 = arith.addf %242, %21 : vector<8x16xf32>
    %cst_65 = arith.constant dense<0xFF800000> : vector<8xf32>
    %244 = vector.multi_reduction <maximumf>, %243, %cst_65 [1] : vector<8x16xf32> to vector<8xf32>
    %245 = vector.shape_cast %244 : vector<8xf32> to vector<8x1xf32>
    %246 = vector.broadcast %245 : vector<8x1xf32> to vector<8x16xf32>
    %247 = arith.subf %243, %246 : vector<8x16xf32>
    %248 = math.exp %247 : vector<8x16xf32>
    %cst_66 = arith.constant dense<0.000000e+00> : vector<8xf32>
    %249 = vector.multi_reduction <add>, %248, %cst_66 [1] : vector<8x16xf32> to vector<8xf32>
    %250 = vector.shape_cast %249 : vector<8xf32> to vector<8x1xf32>
    %251 = tpu.reciprocal %250 {approx = true} : vector<8x1xf32> -> vector<8x1xf32>
    %252 = vector.broadcast %251 : vector<8x1xf32> to vector<8x16xf32>
    %253 = arith.mulf %248, %252 : vector<8x16xf32>
    %254 = vector.extract_strided_slice %160 {offsets = [0, 16], sizes = [16, 8], strides = [1, 1]} : vector<16x32xf32> to vector<16x8xf32>
    %cst_67 = arith.constant dense<0.000000e+00> : vector<8x8xf32>
    %255 = tpu.matmul %253, %254, %cst_67 {dimension_numbers = #tpu.dot_dimension_numbers<[1], [0], [0], [1], [0, 0, 1, 1], [], []>} : vector<8x16xf32>, vector<16x8xf32>, vector<8x8xf32> -> vector<8x8xf32>
    %256 = vector.extract_strided_slice %164 {offsets = [0, 24], sizes = [8, 8], strides = [1, 1]} : vector<8x32xf32> to vector<8x8xf32>
    %257 = vector.extract_strided_slice %159 {offsets = [0, 24], sizes = [16, 8], strides = [1, 1]} : vector<16x32xf32> to vector<16x8xf32>
    %cst_68 = arith.constant dense<0.000000e+00> : vector<8x16xf32>
    %258 = tpu.matmul %256, %257, %cst_68 {dimension_numbers = #tpu.dot_dimension_numbers<[1], [1], [0], [0], [0, 0, 1, 0], [], []>} : vector<8x8xf32>, vector<16x8xf32>, vector<8x16xf32> -> vector<8x16xf32>
    %259 = vector.extract_strided_slice %168 {offsets = [0, 24], sizes = [8, 8], strides = [1, 1]} : vector<8x32xf32> to vector<8x8xf32>
    %260 = vector.extract_strided_slice %28 {offsets = [0, 24], sizes = [24, 8], strides = [1, 1]} : vector<24x32xf32> to vector<24x8xf32>
    %cst_69 = arith.constant dense<0.000000e+00> : vector<8x24xf32>
    %261 = tpu.matmul %259, %260, %cst_69 {dimension_numbers = #tpu.dot_dimension_numbers<[1], [1], [0], [0], [0, 0, 1, 0], [], []>} : vector<8x8xf32>, vector<24x8xf32>, vector<8x24xf32> -> vector<8x24xf32>
    %262 = vector.extract_strided_slice %261 {offsets = [0, 7], sizes = [1, 16], strides = [1, 1]} : vector<8x24xf32> to vector<1x16xf32>
    %263 = vector.extract_strided_slice %261 {offsets = [1, 6], sizes = [1, 16], strides = [1, 1]} : vector<8x24xf32> to vector<1x16xf32>
    %264 = vector.extract_strided_slice %261 {offsets = [2, 5], sizes = [1, 16], strides = [1, 1]} : vector<8x24xf32> to vector<1x16xf32>
    %265 = vector.extract_strided_slice %261 {offsets = [3, 4], sizes = [1, 16], strides = [1, 1]} : vector<8x24xf32> to vector<1x16xf32>
    %266 = vector.extract_strided_slice %261 {offsets = [4, 3], sizes = [1, 16], strides = [1, 1]} : vector<8x24xf32> to vector<1x16xf32>
    %267 = vector.extract_strided_slice %261 {offsets = [5, 2], sizes = [1, 16], strides = [1, 1]} : vector<8x24xf32> to vector<1x16xf32>
    %268 = vector.extract_strided_slice %261 {offsets = [6, 1], sizes = [1, 16], strides = [1, 1]} : vector<8x24xf32> to vector<1x16xf32>
    %269 = vector.extract_strided_slice %261 {offsets = [7, 0], sizes = [1, 16], strides = [1, 1]} : vector<8x24xf32> to vector<1x16xf32>
    %270 = tpu.concatenate %262, %263, %264, %265, %266, %267, %268, %269 in 0 : vector<1x16xf32>, vector<1x16xf32>, vector<1x16xf32>, vector<1x16xf32>, vector<1x16xf32>, vector<1x16xf32>, vector<1x16xf32>, vector<1x16xf32> -> vector<8x16xf32>
    %271 = arith.addf %258, %270 : vector<8x16xf32>
    %272 = arith.addf %271, %21 : vector<8x16xf32>
    %cst_70 = arith.constant dense<0xFF800000> : vector<8xf32>
    %273 = vector.multi_reduction <maximumf>, %272, %cst_70 [1] : vector<8x16xf32> to vector<8xf32>
    %274 = vector.shape_cast %273 : vector<8xf32> to vector<8x1xf32>
    %275 = vector.broadcast %274 : vector<8x1xf32> to vector<8x16xf32>
    %276 = arith.subf %272, %275 : vector<8x16xf32>
    %277 = math.exp %276 : vector<8x16xf32>
    %cst_71 = arith.constant dense<0.000000e+00> : vector<8xf32>
    %278 = vector.multi_reduction <add>, %277, %cst_71 [1] : vector<8x16xf32> to vector<8xf32>
    %279 = vector.shape_cast %278 : vector<8xf32> to vector<8x1xf32>
    %280 = tpu.reciprocal %279 {approx = true} : vector<8x1xf32> -> vector<8x1xf32>
    %281 = vector.broadcast %280 : vector<8x1xf32> to vector<8x16xf32>
    %282 = arith.mulf %277, %281 : vector<8x16xf32>
    %283 = vector.extract_strided_slice %160 {offsets = [0, 24], sizes = [16, 8], strides = [1, 1]} : vector<16x32xf32> to vector<16x8xf32>
    %cst_72 = arith.constant dense<0.000000e+00> : vector<8x8xf32>
    %284 = tpu.matmul %282, %283, %cst_72 {dimension_numbers = #tpu.dot_dimension_numbers<[1], [0], [0], [1], [0, 0, 1, 1], [], []>} : vector<8x16xf32>, vector<16x8xf32>, vector<8x8xf32> -> vector<8x8xf32>
    %285 = tpu.concatenate %197, %226, %255, %284 in 1 : vector<8x8xf32>, vector<8x8xf32>, vector<8x8xf32>, vector<8x8xf32> -> vector<8x32xf32>
    %cst_73 = arith.constant dense<0.000000e+00> : vector<8x32xf32>
    %286 = tpu.matmul %285, %1, %cst_73 {dimension_numbers = #tpu.dot_dimension_numbers<[1], [0], [0], [1], [0, 0, 1, 1], [], []>} : vector<8x32xf32>, vector<32x32xf32>, vector<8x32xf32> -> vector<8x32xf32>
    %287 = tpu.concatenate %157, %286 in 0 : vector<8x32xf32>, vector<8x32xf32> -> vector<16x32xf32>
    %288 = vector.broadcast %3 : vector<1x32xf32> to vector<16x32xf32>
    %289 = arith.addf %287, %288 : vector<16x32xf32>
    %290 = vector.extract_strided_slice %14 {offsets = [8, 0], sizes = [8, 32], strides = [1, 1]} : vector<32x32xf32> to vector<8x32xf32>
    %291 = vector.extract_strided_slice %14 {offsets = [24, 0], sizes = [8, 32], strides = [1, 1]} : vector<32x32xf32> to vector<8x32xf32>
    %292 = tpu.concatenate %290, %291 in 0 : vector<8x32xf32>, vector<8x32xf32> -> vector<16x32xf32>
    %293 = arith.addf %292, %289 : vector<16x32xf32>
    %cst_74 = arith.constant dense<0.000000e+00> : vector<16xf32>
    %294 = vector.multi_reduction <add>, %293, %cst_74 [1] : vector<16x32xf32> to vector<16xf32>
    %295 = vector.shape_cast %294 : vector<16xf32> to vector<16x1xf32>
    %cst_75 = arith.constant 3.200000e+01 : f32
    %296 = vector.broadcast %cst_75 : f32 to vector<16x1xf32>
    %297 = arith.divf %295, %296 : vector<16x1xf32>
    %298 = vector.broadcast %297 : vector<16x1xf32> to vector<16x32xf32>
    %299 = arith.subf %293, %298 : vector<16x32xf32>
    %300 = arith.mulf %299, %299 : vector<16x32xf32>
    %cst_76 = arith.constant dense<0.000000e+00> : vector<16xf32>
    %301 = vector.multi_reduction <add>, %300, %cst_76 [1] : vector<16x32xf32> to vector<16xf32>
    %302 = vector.shape_cast %301 : vector<16xf32> to vector<16x1xf32>
    %cst_77 = arith.constant 3.200000e+01 : f32
    %303 = vector.broadcast %cst_77 : f32 to vector<16x1xf32>
    %304 = arith.divf %302, %303 : vector<16x1xf32>
    %305 = vector.broadcast %297 : vector<16x1xf32> to vector<16x32xf32>
    %306 = arith.subf %293, %305 : vector<16x32xf32>
    %cst_78 = arith.constant 9.99999974E-6 : f32
    %307 = vector.broadcast %cst_78 : f32 to vector<16x1xf32>
    %308 = arith.addf %304, %307 : vector<16x1xf32>
    %309 = math.rsqrt %308 : vector<16x1xf32>
    %310 = vector.broadcast %309 : vector<16x1xf32> to vector<16x32xf32>
    %311 = arith.mulf %306, %310 : vector<16x32xf32>
    %312 = vector.broadcast %9 : vector<1x32xf32> to vector<16x32xf32>
    %313 = arith.mulf %311, %312 : vector<16x32xf32>
    %314 = vector.broadcast %10 : vector<1x32xf32> to vector<16x32xf32>
    %315 = arith.addf %313, %314 : vector<16x32xf32>
    %cst_79 = arith.constant dense<0.000000e+00> : vector<16x64xf32>
    %316 = tpu.matmul %315, %4, %cst_79 {dimension_numbers = #tpu.dot_dimension_numbers<[1], [0], [0], [1], [0, 0, 1, 1], [], []>} : vector<16x32xf32>, vector<32x64xf32>, vector<16x64xf32> -> vector<16x64xf32>
    %317 = vector.broadcast %5 : vector<1x64xf32> to vector<16x64xf32>
    %318 = arith.addf %316, %317 : vector<16x64xf32>
    %319 = arith.mulf %318, %318 : vector<16x64xf32>
    %320 = arith.mulf %318, %319 : vector<16x64xf32>
    %cst_80 = arith.constant 4.471500e-02 : f32
    %321 = vector.broadcast %cst_80 : f32 to vector<16x64xf32>
    %322 = arith.mulf %321, %320 : vector<16x64xf32>
    %323 = arith.addf %318, %322 : vector<16x64xf32>
    %cst_81 = arith.constant 0.797884583 : f32
    %324 = vector.broadcast %cst_81 : f32 to vector<16x64xf32>
    %325 = arith.mulf %324, %323 : vector<16x64xf32>
    %326 = math.tanh %325 : vector<16x64xf32>
    %cst_82 = arith.constant 1.000000e+00 : f32
    %327 = vector.broadcast %cst_82 : f32 to vector<16x64xf32>
    %328 = arith.addf %327, %326 : vector<16x64xf32>
    %cst_83 = arith.constant 5.000000e-01 : f32
    %329 = vector.broadcast %cst_83 : f32 to vector<16x64xf32>
    %330 = arith.mulf %329, %328 : vector<16x64xf32>
    %331 = arith.mulf %318, %330 : vector<16x64xf32>
    %cst_84 = arith.constant dense<0.000000e+00> : vector<16x32xf32>
    %332 = tpu.matmul %331, %6, %cst_84 {dimension_numbers = #tpu.dot_dimension_numbers<[1], [0], [0], [1], [0, 0, 1, 1], [], []>} : vector<16x64xf32>, vector<64x32xf32>, vector<16x32xf32> -> vector<16x32xf32>
    %333 = vector.broadcast %13 : vector<1x32xf32> to vector<16x32xf32>
    %334 = arith.addf %332, %333 : vector<16x32xf32>
    %335 = arith.addf %315, %334 : vector<16x32xf32>
    %cst_85 = arith.constant dense<0.000000e+00> : vector<16xf32>
    %336 = vector.multi_reduction <add>, %335, %cst_85 [1] : vector<16x32xf32> to vector<16xf32>
    %337 = vector.shape_cast %336 : vector<16xf32> to vector<16x1xf32>
    %cst_86 = arith.constant 3.200000e+01 : f32
    %338 = vector.broadcast %cst_86 : f32 to vector<16x1xf32>
    %339 = arith.divf %337, %338 : vector<16x1xf32>
    %340 = vector.broadcast %339 : vector<16x1xf32> to vector<16x32xf32>
    %341 = arith.subf %335, %340 : vector<16x32xf32>
    %342 = arith.mulf %341, %341 : vector<16x32xf32>
    %cst_87 = arith.constant dense<0.000000e+00> : vector<16xf32>
    %343 = vector.multi_reduction <add>, %342, %cst_87 [1] : vector<16x32xf32> to vector<16xf32>
    %344 = vector.shape_cast %343 : vector<16xf32> to vector<16x1xf32>
    %cst_88 = arith.constant 3.200000e+01 : f32
    %345 = vector.broadcast %cst_88 : f32 to vector<16x1xf32>
    %346 = arith.divf %344, %345 : vector<16x1xf32>
    %347 = vector.broadcast %339 : vector<16x1xf32> to vector<16x32xf32>
    %348 = arith.subf %335, %347 : vector<16x32xf32>
    %cst_89 = arith.constant 9.99999974E-6 : f32
    %349 = vector.broadcast %cst_89 : f32 to vector<16x1xf32>
    %350 = arith.addf %346, %349 : vector<16x1xf32>
    %351 = math.rsqrt %350 : vector<16x1xf32>
    %352 = vector.broadcast %351 : vector<16x1xf32> to vector<16x32xf32>
    %353 = arith.mulf %348, %352 : vector<16x32xf32>
    %354 = vector.broadcast %11 : vector<1x32xf32> to vector<16x32xf32>
    %355 = arith.mulf %353, %354 : vector<16x32xf32>
    %356 = vector.broadcast %12 : vector<1x32xf32> to vector<16x32xf32>
    %357 = arith.addf %355, %356 : vector<16x32xf32>
    %c0_90 = arith.constant 0 : index
    %c0_91 = arith.constant 0 : index
    %358 = vector.load %arg6[%c0_90, %c0_91] : memref<16x32xf32, #tpu.memory_space<vmem>>, vector<16x32xf32>
    tpu.vector_store %arg6[%c0_90, %c0_91], %357 {strides = array<i32>} : memref<16x32xf32, #tpu.memory_space<vmem>>, vector<16x32xf32>,
    return
  }
}

</mosaic_0001>

<bundles_post_ra>
// kernel: tpu_custom_call.1
= control target key start
LH: loop header
LB: loop body
LE: loop exit
PB: predicated region body
PF: predicated region fallthrough
CT: control target
= control target key end

     0   :  { %vm64_vm0 = vcmask 261120   ;;  %v3844_v6 = vmov 0.0|0.0   ;;  %vm3845_vm1 = vmmov 0   ;;  %v3846_v8 = vmov 0.0   ;;  %s4541_s0 = inlined_call_operand.vmem [shape: f32[32,32], index: 0, kind: input, shape index: {}]   ;;  %s4542_s1 = inlined_call_operand.vmem [shape: f32[8,16], index: 1, kind: input, shape index: {}]   ;;  %s4543_s2 = inlined_call_operand.vmem [shape: f32[24,32], index: 2, kind: input, shape index: {}]   ;;  %s4544_s3 = inlined_call_operand.vmem [shape: f32[40,160], index: 3, kind: input, shape index: {}]   ;;  %s4545_s4 = inlined_call_operand.vmem [shape: f32[104,64], index: 4, kind: input, shape index: {}]   ;;  %s4546_s5 = inlined_call_operand.vmem [shape: f32[8,32], index: 5, kind: input, shape index: {}]   ;;  %s4547_s6 = inlined_call_operand.hbm [shape: f32[16,32], index: 6, kind: output, shape index: {}]  }
   0x1   :  { %v24_v0 = vld [vmem:[%s4544_s3] sm:$0xff]  ;;  %v25_v1 = vld [vmem:[%s4544_s3 + $0x10] sm:$0xff]  ;;  %3525 = vmatprep.subr.bf16.mxu1 %v3844_v6  ;;  %3284 = vmatprep.mubr.msk.f32.mxu1 %vm3845_vm1, %v3846_v8 }
   0x2   :  { %v26_v2 = vld [vmem:[%s4544_s3 + $0x20] sm:$0xff]  ;;  %v3507_v3 = vpack.c.bf16 %v25_v1, %v24_v0  ;;  %v27_v4 = vld [vmem:[%s4544_s3 + $0x30] sm:$0xff] }
   0x3   :  { %v54_v5 = vld [vmem:[%s4541_s0] sm:$0xff]  ;;  %v3511_v7 = vpack.c.bf16 %v27_v4, %v26_v2 }
   0x4   :  { %3248 = vmatprep.mubr.msk.f32.mxu0 %vm64_vm0, %v54_v5  ;;  %3508 = vmatprep.subr.bf16.mxu0 %v3507_v3 }
   0x5   :  { %11 = vsyncpa [#allocation3], 0  ;;  %3510 = vmatpush3.bf16.msra.mxu0 %v3507_v3  ;;  %v55_v9 = vld [vmem:[%s4541_s0 + $0x8] sm:$0xff]  ;;  %v56_v10 = vld [vmem:[%s4541_s0 + $0x10] sm:$0xff]  ;;  %s3848_s25 = smov 32   ;;  %vm272_vm2 = vcmask 64512  }
   0x6   :  { %3512 = vmatprep.subr.bf16.mxu0 %v3511_v7  ;;  %v57_v11 = vld [vmem:[%s4541_s0 + $0x18] sm:$0xff]  ;;  %v58_v12 = vld [vmem:[%s4543_s2] sm:$0xff]  ;;  %v59_v13 = vld [vmem:[%s4543_s2 + $0x8] sm:$0xff]  ;;  %s3849_s26 = smov 2   ;;  %s3850_s27 = smov 1   ;;  %vm374_vm4 = vcmask 1040384  }
   0x7   :  { %v60_v14 = vld [vmem:[%s4543_s2 + $0x10] sm:$0xff]  ;;  %v32_v15 = vld [vmem:[%s4544_s3 + $0x40] ss:$0 sm:$0xff]  ;;  %s3847_s2 = smov 96   ;;  %v3042_v26 = vld [vmem:[%s4546_s5 + $0x1] ss:$0 sm:$0xff] }
   0x8   :  { %v3041_v25 = vld [vmem:[%s4546_s5] ss:$0 sm:$0xff]  ;;  %vm3989_vm3 = vmpackc.low %vm272_vm2, %vm272_vm2  ;;  %s3851_s28 = smov 4   ;;  %s3852_s29 = smov 3   ;;  %vm376_vm5 = vcmask 1041408   ;;  %vm378_vm6 = vcmask 1042432  }
   0x9   :  { %3514 = vmatpush3.bf16.msra.mxu0 %v3511_v7  ;;  %s3853_s30 = smov 6   ;;  %s3854_s7 = smov 5   ;;  %vm380_vm7 = vcmask 1043456   ;;  %vm382_vm8 = vcmask 1044480   ;;  %vm384_vm9 = vcmask 1045504   ;;  %vm386_vm10 = vcmask 1046528  }
   0xa   :  { %3515 = vmatprep.subr.bf16.mxu0 %v3844_v6  ;;  %s3855_s8 = smov 7   ;;  %s3856_s9 = smov 121   ;;  %vm476_vm12 = vcmask 130048   ;;  %vm1457_vm13 = vcmask 195584   ;;  %vm2894_vm14 = vcmask 523264  }
   0xb   :  { %s3858_s12 = smov 24   ;;  %s3860_s13 = smov 64  }
   0xc   :  { %3249 = vmatmul.mubr.msk.f32.vlgmr.msra.gmra.mrb[0].mxu0 %vm64_vm0, %v55_v9  ;;  %s3861_s14 = smov 120   ;;  %s4550_s15 = smov 16  }
   0xd   :  { %3517 = vmatpush3.bf16.msra.mxu0 %v3507_v3  ;;  %3251 = vmatprep.mubr.msk.f32.mxu0 %vm64_vm0, %v56_v10  ;;  %v61_v10 = vld [vmem:[%s4542_s1] sm:$0xff]  ;;  %s3859_s1 = smov 88   ;;  %s3863_s16 = smov 112  }
   0xe   :  { %3518 = vmatprep.subr.bf16.mxu0 %v3844_v6  ;;  %vm62_vm11 = vcmp.gt.f32.partialorder %v61_v10, 0.0  ;;  %s3864_s17 = smov 56   ;;  %s3865_s18 = smov 80  }
   0xf   :  { %s4548_s19 = smov 8   ;;  %s3867_s20 = smov 104  }
  0x10   :  { %3252 = vmatmul.mubr.msk.f32.gmra.mrb[2].mxu0 %vm64_vm0, %v57_v11  ;;  %s3868_s21 = smov 48   ;;  %s3869_s22 = smov 72  }
  0x11   :  { %3520 = vmatpush3.bf16.msra.mxu0 %v3511_v7  ;;  %3262 = vmatprep.mubr.msk.f32.mxu0 %vm3845_vm1, %v3846_v8  ;;  %s4551_s23 = smov 40  }
  0x12   :  { %3521 = vmatprep.subr.bf16.mxu0 %v3844_v6 }
  0x14   :  { %3263 = vmatmul.mubr.msk.f32.vlgmr.msra.gmra.mrb[4].mxu0 %vm64_vm0, %v58_v12  ;;  %v3857_v12 = vmov -1e+30  }
  0x15   :  { %3265 = vmatprep.mubr.msk.f32.mxu0 %vm3845_vm1, %v3846_v8 }
  0x18   :  { %3266 = vmatmul.mubr.msk.f32.gmra.mrb[6].mxu0 %vm64_vm0, %v59_v13  ;;  %v4037_v13 = vsel %vm62_vm11, 0.0, %v3857_v12 }
  0x19   :  { %3268 = vmatprep.mubr.msk.f32.mxu0 %vm3845_vm1, %v3846_v8 }
  0x1c   :  { %3269 = vmatmul.mubr.msk.f32.gmra.mrb[8].mxu0 %vm64_vm0, %v60_v14 }
  0x1d   :  { %3277 = vmatprep.mubr.msk.f32.mxu0 %vm3845_vm1, %v3846_v8 }
  0xdf   :  { %v3250_v16 = vpop.f32.mrb[0].mxu0 }
  0xe0   :  { %v149_v17 = vadd.f32 %v3250_v16, %v32_v15  ;;  %v143_v18 = vpop.f32.mrb[1].mxu0 }
  0xe1   :  { %v144_v19 = vadd.f32 %v143_v18, %v32_v15 }
  0xe2   :  { %v255_v45 = vadd.f32 %v3041_v25, %v149_v17  ;;  %v261_v52 = vadd.f32 %v3042_v26, %v149_v17 }
  0xe3   :  { %v3253_v20 = vpop.f32.mrb[2].mxu0  ;;  %v3965_v21 = vpack.i.bf16 %v149_v17, %v144_v19 }
  0xe4   :  { %v159_v22 = vadd.f32 %v3253_v20, %v32_v15  ;;  %v153_v23 = vpop.f32.mrb[3].mxu0  ;;  %v3996_v46 = vmul.f32 0.35355338, %v255_v45  ;;  %v4012_v53 = vmul.f32 0.35355338, %v261_v52 }
  0xe5   :  { %v154_v24 = vadd.f32 %v153_v23, %v32_v15  ;;  %3680 = vrot.lane.b32.xlu1 %v3965_v21, %s3847_s2 }
  0xe6   :  { %v3975_v27 = vadd.f32 %v3041_v25, %v159_v22  ;;  %v3977_v28 = vadd.f32 %v3042_v26, %v159_v22 }
  0xe7   :  { %v237_v29 = vpop.f32.mrb[4].mxu0  ;;  %v3979_v30 = vpack.i.bf16 %v159_v22, %v154_v24 }
  0xe8   :  { %v3264_v31 = vpop.f32.mrb[5].mxu0  ;;  %v238_v33 = vadd.f32 %v237_v29, %v32_v15 }
  0xeb   :  { %v242_v32 = vpop.f32.mrb[6].mxu0 }
  0xec   :  { %v243_v34 = vadd.f32 %v242_v32, %v32_v15  ;;  %v3267_v35 = vpop.f32.mrb[7].mxu0 }
  0xee   :  { %v3981_v36 = vpack.i.bf16 %v243_v34, %v238_v33 }
  0xef   :  { %v247_v37 = vpop.f32.mrb[8].mxu0 }
  0xf0   :  { %3675 = vrot.lane.b32.xlu0 %v3981_v36, %s3848_s25  ;;  %v3984_v38 = vadd.f32 %v247_v37, %v32_v15  ;;  %v3270_v39 = vpop.f32.mrb[9].mxu0 }
  0xf4   :  { %270 = vrot.lane.b32.xlu0 %v3984_v38, %s3848_s25 }
 0x157   :  { %v3681_v40 = vpop.permute.xlu1 %3680 }
 0x158   :  { %v3683_v41 = vunpack.i.h.bf16 %v3681_v40  ;;  %v3682_v42 = vunpack.i.l.bf16 %v3681_v40 }
 0x15a   :  { %v3526_v44 = vpack.c.bf16 %v3683_v41, %v3682_v42 }
 0x15c   :  { %3528 = vmatpush3.bf16.xpose.msk.msra.mxu1 %vm3989_vm3, %v3526_v44 }
 0x15d   :  { %3529 = vmatprep.subr.bf16.mxu1 %v3844_v6 }
 0x162   :  { %v3676_v47 = vpop.permute.xlu0 %3675 }
 0x163   :  { %v3678_v48 = vunpack.i.h.bf16 %v3676_v47  ;;  %v3677_v49 = vunpack.i.l.bf16 %v3676_v47  ;;  %3285 = vmatmul.mubr.msk.f32.vlgmr.msra.gmra.mrb[0].mxu1 %vm272_vm2, %v3996_v46 }
 0x164   :  { %3291 = vmatprep.mubr.msk.f32.mxu1 %vm3845_vm1, %v3846_v8 }
 0x165   :  { %v4002_v50 = vpack.c.bf16 %v3678_v48, %v3677_v49 }
 0x166   :  { %v4008_v51 = vpop.permute.xlu0 %270 }
 0x167   :  { %3524 = vmatpush3.bf16.xpose.msk.msra.mxu0 %vm3989_vm3, %v4002_v50 }
 0x168   :  { %3275 = vmatprep.subr.mxu0 %v3846_v8 }
 0x16f   :  { %3276 = vmatpush3.xpose.msk.msra.mxu0 %vm272_vm2, %v4008_v51 }
 0x170   :  { %3536 = vmatprep.subr.bf16.mxu0 %v3844_v6 }
 0x172   :  { %3278 = vmatmul.mubr.msk.f32.vlgmr.msra.gmra.mrb[10].mxu0 %vm272_vm2, %v4012_v53 }
 0x173   :  { %3307 = vmatprep.mubr.msk.f32.mxu0 %vm3845_vm1, %v3846_v8 }
 0x236   :  { %v471_v54 = vpop.f32.mrb[0].mxu1 }
 0x237   :  { %v3286_v55 = vpop.f32.mrb[1].mxu1 }
 0x245   :  { %v348_v56 = vpop.f32.mrb[10].mxu0 }
 0x246   :  { %356 = vrot.lane.b32.xlu0 %v348_v56, %s3849_s26  ;;  %v3279_v57 = vpop.f32.mrb[11].mxu0  ;;  %353 = vrot.lane.b32.xlu1 %v348_v56, %s3850_s27 }
 0x24a   :  { %362 = vrot.lane.b32.xlu0 %v348_v56, %s3851_s28  ;;  %359 = vrot.lane.b32.xlu1 %v348_v56, %s3852_s29 }
 0x24e   :  { %368 = vrot.lane.b32.xlu0 %v348_v56, %s3853_s30  ;;  %365 = vrot.lane.b32.xlu1 %v348_v56, %s3854_s7 }
 0x252   :  { %371 = vrot.lane.b32.xlu1 %v348_v56, %s3855_s8 }
 0x2b8   :  { %v357_v58 = vpop.permute.xlu0 %356  ;;  %v354_v59 = vpop.permute.xlu1 %353 }
 0x2b9   :  { %v375_v60 = vsel %vm374_vm4, %v348_v56, %v354_v59 }
 0x2ba   :  { %v377_v62 = vsel %vm376_vm5, %v375_v60, %v357_v58 }
 0x2bc   :  { %v363_v61 = vpop.permute.xlu0 %362  ;;  %v360_v63 = vpop.permute.xlu1 %359 }
 0x2bd   :  { %v379_v0 = vsel %vm378_vm6, %v377_v62, %v360_v63 }
 0x2be   :  { %v381_v1 = vsel %vm380_vm7, %v379_v0, %v363_v61 }
 0x2c0   :  { %v366_v2 = vpop.permute.xlu1 %365  ;;  %v369_v3 = vpop.permute.xlu0 %368 }
 0x2c1   :  { %v383_v4 = vsel %vm382_vm8, %v381_v1, %v366_v2 }
 0x2c2   :  { %v385_v7 = vsel %vm384_vm9, %v383_v4, %v369_v3 }
 0x2c4   :  { %v372_v5 = vpop.permute.xlu1 %371 }
 0x2c5   :  { %v387_v9 = vsel %vm386_vm10, %v385_v7, %v372_v5 }
 0x2c6   :  { %395 = vrot.lane.b32.xlu0 %v387_v9, %s3856_s9 }
 0x338   :  { %v396_v11 = vpop.permute.xlu0 %395 }
 0x339   :  { %v472_v14 = vadd.f32 %v471_v54, %v396_v11 }
 0x33b   :  { %v475_v15 = vadd.f32 %v472_v14, %v4037_v13 }
 0x33d   :  { %v477_v16 = vsel %vm476_vm12, %v475_v15, -inf }
 0x33e   :  { %478 = vmax.xlane.f32.xlu1 %v477_v16 }
 0x34f   :  { %3690 = vrot.lane.b32.xlu1 %v3981_v36, %s3858_s12 }
 0x353   :  { %573 = vrot.lane.b32.xlu1 %v3984_v38, %s3858_s12 }
 0x357   :  { %3695 = vrot.lane.b32.xlu1 %v3965_v21, %s3859_s1 }
 0x3cb   :  { %v479_v17 = vpop.xlane.xlu1 %478 }
 0x3cc   :  { %v480_v18 = vsub.f32 %v475_v15, %v479_v17 }
 0x3ce   :  { %v481_v19 = vmul.f32 1.442695, %v480_v18 }
 0x3cf   :  { %v3691_v20 = vpop.permute.xlu1 %3690 }
 0x3d0   :  { %3774 = vpow2.f32 %v481_v19  ;;  %v3693_v41 = vunpack.i.h.bf16 %v3691_v20  ;;  %v3692_v42 = vunpack.i.l.bf16 %v3691_v20 }
 0x3d2   :  { %v4066_v47 = vpack.c.bf16 %v3693_v41, %v3692_v42 }
 0x3d3   :  { %v4047_v22 = vpop.permute.xlu1 %573 }
 0x3d7   :  { %v3696_v23 = vpop.permute.xlu1 %3695 }
 0x3d8   :  { %v3698_v24 = vunpack.i.h.bf16 %v3696_v23  ;;  %v3697_v25 = vunpack.i.l.bf16 %v3696_v23 }
 0x3da   :  { %v3775_v26 = vpop.eup %3774  ;;  %v3537_v29 = vpack.c.bf16 %v3698_v24, %v3697_v25 }
 0x3db   :  { %v483_v31 = vsel %vm476_vm12, %v3775_v26, 0.0 }
 0x3dc   :  { %484 = vadd.xlane.f32.xlu0 %v483_v31  ;;  %3539 = vmatpush3.bf16.xpose.msk.msra.mxu0 %vm3989_vm3, %v3537_v29 }
 0x3dd   :  { %3540 = vmatprep.subr.bf16.mxu0 %v3844_v6 }
 0x3f2   :  { %3685 = vrot.lane.b32.xlu0 %v3965_v21, %s3860_s13 }
 0x3f6   :  { %567 = vrot.lane.b32.xlu0 %v4012_v53, %s3861_s14 }
 0x3fa   :  { %682 = vrot.lane.b32.xlu0 %v3996_v46, %s3861_s14 }
 0x469   :  { %v485_v32 = vpop.xlane.xlu0 %484 }
 0x46a   :  { %3776 = vrcp.f32 %v485_v32 }
 0x46d   :  { %v3686_v33 = vpop.permute.xlu0 %3685 }
 0x46e   :  { %v3688_v34 = vunpack.i.h.bf16 %v3686_v33  ;;  %v3687_v35 = vunpack.i.l.bf16 %v3686_v33 }
 0x470   :  { %v3530_v37 = vpack.c.bf16 %v3688_v34, %v3687_v35 }
 0x471   :  { %v568_v39 = vpop.permute.xlu0 %567 }
 0x472   :  { %3531 = vmatpush3.bf16.msra.mxu1 %v3530_v37 }
 0x473   :  { %3532 = vmatprep.subr.bf16.mxu1 %v3844_v6 }
 0x474   :  { %v3777_v40 = vpop.eup %3776 }
 0x475   :  { %v683_v44 = vpop.permute.xlu0 %682  ;;  %v487_v45 = vmul.f32 %v3777_v40, %v3775_v26 }
 0x476   :  { %3308 = vmatmul.mubr.msk.f32.vlgmr.msra.gmra.mrb[12].mxu0 %vm272_vm2, %v683_v44 }
 0x477   :  { %3292 = vmatmul.mubr.msk.f32.vlgmr.msra.gmra.mrb[2].mxu1 %vm476_vm12, %v487_v45  ;;  %3314 = vmatprep.mubr.msk.f32.mxu0 %vm3845_vm1, %v3846_v8 }
 0x478   :  { %3300 = vmatprep.mubr.msk.f32.mxu1 %vm3845_vm1, %v3846_v8 }
 0x47b   :  { %3535 = vmatpush3.bf16.xpose.msk.msra.mxu1 %vm3989_vm3, %v4066_v47 }
 0x47c   :  { %3298 = vmatprep.subr.mxu1 %v3846_v8 }
 0x483   :  { %3299 = vmatpush3.xpose.msk.msra.mxu1 %vm272_vm2, %v4047_v22 }
 0x484   :  { %3543 = vmatprep.subr.bf16.mxu1 %v3844_v6 }
 0x486   :  { %3301 = vmatmul.mubr.msk.f32.vlgmr.msra.gmra.mrb[4].mxu1 %vm272_vm2, %v568_v39 }
 0x487   :  { %3323 = vmatprep.mubr.msk.f32.mxu1 %vm3845_vm1, %v3846_v8 }
 0x549   :  { %v764_v48 = vpop.f32.mrb[12].mxu0 }
 0x54a   :  { %v4078_v49 = vpop.f32.mrb[2].mxu1  ;;  %v3309_v52 = vpop.f32.mrb[13].mxu0 }
 0x54b   :  { %v3293_v54 = vpop.f32.mrb[3].mxu1 }
 0x559   :  { %v649_v55 = vpop.f32.mrb[4].mxu1 }
 0x55a   :  { %657 = vrot.lane.b32.xlu0 %v649_v55, %s3849_s26  ;;  %654 = vrot.lane.b32.xlu1 %v649_v55, %s3850_s27  ;;  %v3302_v56 = vpop.f32.mrb[5].mxu1 }
 0x55e   :  { %663 = vrot.lane.b32.xlu0 %v649_v55, %s3851_s28  ;;  %660 = vrot.lane.b32.xlu1 %v649_v55, %s3852_s29 }
 0x562   :  { %669 = vrot.lane.b32.xlu0 %v649_v55, %s3853_s30  ;;  %666 = vrot.lane.b32.xlu1 %v649_v55, %s3854_s7 }
 0x566   :  { %672 = vrot.lane.b32.xlu1 %v649_v55, %s3855_s8 }
 0x56a   :  { %3700 = vrot.lane.b32.xlu1 %v3981_v36, %s4550_s15 }
 0x56e   :  { %859 = vrot.lane.b32.xlu1 %v4012_v53, %s3863_s16 }
 0x5cc   :  { %v658_v57 = vpop.permute.xlu0 %657  ;;  %v655_v58 = vpop.permute.xlu1 %654 }
 0x5cd   :  { %v675_v59 = vsel %vm374_vm4, %v649_v55, %v655_v58 }
 0x5ce   :  { %v676_v61 = vsel %vm376_vm5, %v675_v59, %v658_v57 }
 0x5d0   :  { %v664_v60 = vpop.permute.xlu0 %663  ;;  %v661_v62 = vpop.permute.xlu1 %660 }
 0x5d1   :  { %v677_v63 = vsel %vm378_vm6, %v676_v61, %v661_v62 }
 0x5d2   :  { %v678_v0 = vsel %vm380_vm7, %v677_v63, %v664_v60 }
 0x5d4   :  { %v667_v1 = vpop.permute.xlu1 %666  ;;  %v670_v2 = vpop.permute.xlu0 %669 }
 0x5d5   :  { %v679_v3 = vsel %vm382_vm8, %v678_v0, %v667_v1 }
 0x5d6   :  { %v680_v5 = vsel %vm384_vm9, %v679_v3, %v670_v2 }
 0x5d8   :  { %v673_v4 = vpop.permute.xlu1 %672 }
 0x5d9   :  { %v681_v7 = vsel %vm386_vm10, %v680_v5, %v673_v4 }
 0x5da   :  { %689 = vrot.lane.b32.xlu0 %v681_v7, %s3856_s9 }
 0x5dc   :  { %v3701_v9 = vpop.permute.xlu1 %3700 }
 0x5dd   :  { %v3703_v10 = vunpack.i.h.bf16 %v3701_v9  ;;  %v3702_v11 = vunpack.i.l.bf16 %v3701_v9 }
 0x5de   :  { %865 = vrot.lane.b32.xlu0 %v3984_v38, %s4550_s15 }
 0x5df   :  { %v4101_v12 = vpack.c.bf16 %v3703_v10, %v3702_v11 }
 0x5e0   :  { %v860_v19 = vpop.permute.xlu1 %859 }
 0x5e1   :  { %3546 = vmatpush3.bf16.xpose.msk.msra.mxu1 %vm3989_vm3, %v4101_v12 }
 0x5e2   :  { %3321 = vmatprep.subr.mxu1 %v3846_v8 }
 0x64c   :  { %v690_v14 = vpop.permute.xlu0 %689 }
 0x64d   :  { %v765_v15 = vadd.f32 %v764_v48, %v690_v14 }
 0x64f   :  { %v768_v16 = vadd.f32 %v765_v15, %v4037_v13 }
 0x650   :  { %v4108_v17 = vpop.permute.xlu0 %865 }
 0x651   :  { %3322 = vmatpush3.xpose.msk.msra.mxu1 %vm272_vm2, %v4108_v17  ;;  %v769_v18 = vsel %vm476_vm12, %v768_v16, -inf }
 0x652   :  { %770 = vmax.xlane.f32.xlu0 %v769_v18  ;;  %3554 = vmatprep.subr.bf16.mxu1 %v3844_v6 }
 0x654   :  { %3324 = vmatmul.mubr.msk.f32.vlgmr.msra.gmra.mrb[6].mxu1 %vm272_vm2, %v860_v19 }
 0x655   :  { %3346 = vmatprep.mubr.msk.f32.mxu1 %vm3845_vm1, %v3846_v8 }
 0x668   :  { %3705 = vrot.lane.b32.xlu0 %v3965_v21, %s3864_s17 }
 0x66c   :  { %974 = vrot.lane.b32.xlu0 %v3996_v46, %s3863_s16 }
 0x6df   :  { %v771_v20 = vpop.xlane.xlu0 %770 }
 0x6e0   :  { %v772_v23 = vsub.f32 %v768_v16, %v771_v20 }
 0x6e2   :  { %v773_v24 = vmul.f32 1.442695, %v772_v23 }
 0x6e3   :  { %v3706_v25 = vpop.permute.xlu0 %3705 }
 0x6e4   :  { %3778 = vpow2.f32 %v773_v24  ;;  %v3708_v26 = vunpack.i.h.bf16 %v3706_v25  ;;  %v3707_v29 = vunpack.i.l.bf16 %v3706_v25 }
 0x6e6   :  { %v3541_v31 = vpack.c.bf16 %v3708_v26, %v3707_v29 }
 0x6e8   :  { %3542 = vmatpush3.bf16.msra.mxu0 %v3541_v31 }
 0x6e9   :  { %3547 = vmatprep.subr.bf16.mxu0 %v3844_v6 }
 0x6ee   :  { %v3779_v32 = vpop.eup %3778 }
 0x6ef   :  { %v775_v33 = vsel %vm476_vm12, %v3779_v32, 0.0 }
 0x6f0   :  { %776 = vadd.xlane.f32.xlu1 %v775_v33 }
 0x701   :  { %3710 = vrot.lane.b32.xlu1 %v3965_v21, %s3865_s18 }
 0x727   :  { %v941_v34 = vpop.f32.mrb[6].mxu1 }
 0x728   :  { %949 = vrot.lane.b32.xlu0 %v941_v34, %s3849_s26  ;;  %946 = vrot.lane.b32.xlu1 %v941_v34, %s3850_s27  ;;  %v3325_v35 = vpop.f32.mrb[7].mxu1 }
 0x72c   :  { %955 = vrot.lane.b32.xlu0 %v941_v34, %s3851_s28  ;;  %952 = vrot.lane.b32.xlu1 %v941_v34, %s3852_s29 }
 0x730   :  { %961 = vrot.lane.b32.xlu0 %v941_v34, %s3853_s30  ;;  %958 = vrot.lane.b32.xlu1 %v941_v34, %s3854_s7 }
 0x734   :  { %964 = vrot.lane.b32.xlu1 %v941_v34, %s3855_s8 }
 0x738   :  { %3715 = vrot.lane.b32.xlu1 %v3981_v36, %s4548_s19  ;;  %v975_v36 = vpop.permute.xlu0 %974 }
 0x73c   :  { %1151 = vrot.lane.b32.xlu1 %v4012_v53, %s3867_s20 }
 0x77d   :  { %v777_v37 = vpop.xlane.xlu1 %776 }
 0x77e   :  { %3780 = vrcp.f32 %v777_v37 }
 0x781   :  { %v3711_v39 = vpop.permute.xlu1 %3710 }
 0x782   :  { %v3713_v40 = vunpack.i.h.bf16 %v3711_v39  ;;  %v3712_v41 = vunpack.i.l.bf16 %v3711_v39 }
 0x784   :  { %v3548_v45 = vpack.c.bf16 %v3713_v40, %v3712_v41 }
 0x788   :  { %v3781_v42 = vpop.eup %3780 }
 0x789   :  { %v779_v44 = vmul.f32 %v3781_v42, %v3779_v32 }
 0x78b   :  { %3315 = vmatmul.mubr.msk.f32.vlgmr.msra.gmra.mrb[14].mxu0 %vm476_vm12, %v779_v44 }
 0x78c   :  { %3550 = vmatpush3.bf16.xpose.msk.msra.mxu0 %vm3989_vm3, %v3548_v45  ;;  %3330 = vmatprep.mubr.msk.f32.mxu0 %vm3845_vm1, %v3846_v8 }
 0x78d   :  { %3551 = vmatprep.subr.bf16.mxu0 %v3844_v6 }
 0x793   :  { %3331 = vmatmul.mubr.msk.f32.vlgmr.msra.gmra.mrb[16].mxu0 %vm272_vm2, %v975_v36 }
 0x794   :  { %3337 = vmatprep.mubr.msk.f32.mxu0 %vm3845_vm1, %v3846_v8 }
 0x79a   :  { %v950_v53 = vpop.permute.xlu0 %949  ;;  %v947_v48 = vpop.permute.xlu1 %946 }
 0x79b   :  { %v967_v52 = vsel %vm374_vm4, %v941_v34, %v947_v48 }
 0x79c   :  { %v968_v55 = vsel %vm376_vm5, %v967_v52, %v950_v53 }
 0x79e   :  { %v956_v54 = vpop.permute.xlu0 %955  ;;  %v953_v56 = vpop.permute.xlu1 %952 }
 0x79f   :  { %v969_v57 = vsel %vm378_vm6, %v968_v55, %v953_v56 }
 0x7a0   :  { %v970_v58 = vsel %vm380_vm7, %v969_v57, %v956_v54 }
 0x7a2   :  { %v959_v59 = vpop.permute.xlu1 %958  ;;  %v962_v60 = vpop.permute.xlu0 %961 }
 0x7a3   :  { %v971_v61 = vsel %vm382_vm8, %v970_v58, %v959_v59 }
 0x7a4   :  { %v972_v63 = vsel %vm384_vm9, %v971_v61, %v962_v60 }
 0x7a6   :  { %v965_v62 = vpop.permute.xlu1 %964 }
 0x7a7   :  { %v973_v0 = vsel %vm386_vm10, %v972_v63, %v965_v62 }
 0x7a8   :  { %981 = vrot.lane.b32.xlu0 %v973_v0, %s3856_s9 }
 0x7aa   :  { %v3716_v1 = vpop.permute.xlu1 %3715 }
 0x7ab   :  { %v3718_v2 = vunpack.i.h.bf16 %v3716_v1  ;;  %v3717_v3 = vunpack.i.l.bf16 %v3716_v1 }
 0x7ac   :  { %1157 = vrot.lane.b32.xlu0 %v3984_v38, %s4548_s19 }
 0x7ad   :  { %v4155_v4 = vpack.c.bf16 %v3718_v2, %v3717_v3 }
 0x7ae   :  { %v1152_v9 = vpop.permute.xlu1 %1151 }
 0x7af   :  { %3557 = vmatpush3.bf16.xpose.msk.msra.mxu1 %vm3989_vm3, %v4155_v4 }
 0x7b0   :  { %3344 = vmatprep.subr.mxu1 %v3846_v8 }
 0x81a   :  { %v982_v5 = vpop.permute.xlu0 %981 }
 0x81e   :  { %v4161_v7 = vpop.permute.xlu0 %1157 }
 0x81f   :  { %3345 = vmatpush3.xpose.msk.msra.mxu1 %vm272_vm2, %v4161_v7 }
 0x820   :  { %3565 = vmatprep.subr.bf16.mxu1 %v3844_v6 }
 0x822   :  { %3347 = vmatmul.mubr.msk.f32.vlgmr.msra.gmra.mrb[8].mxu1 %vm272_vm2, %v1152_v9 }
 0x823   :  { %3371 = vmatprep.mubr.msk.f32.mxu1 %vm3845_vm1, %v3846_v8 }
 0x85e   :  { %v4169_v38 = vpop.f32.mrb[14].mxu0 }
 0x85f   :  { %v3316_v10 = vpop.f32.mrb[15].mxu0 }
 0x866   :  { %v1056_v11 = vpop.f32.mrb[16].mxu0 }
 0x867   :  { %v1057_v14 = vadd.f32 %v1056_v11, %v982_v5  ;;  %v3332_v15 = vpop.f32.mrb[17].mxu0 }
 0x869   :  { %v1060_v16 = vadd.f32 %v1057_v14, %v4037_v13 }
 0x86b   :  { %v1061_v18 = vsel %vm476_vm12, %v1060_v16, -inf }
 0x86c   :  { %1062 = vmax.xlane.f32.xlu0 %v1061_v18 }
 0x882   :  { %3720 = vrot.lane.b32.xlu0 %v3965_v21, %s3868_s21 }
 0x886   :  { %1266 = vrot.lane.b32.xlu0 %v3996_v46, %s3867_s20 }
 0x8f5   :  { %v1233_v19 = vpop.f32.mrb[8].mxu1 }
 0x8f6   :  { %1241 = vrot.lane.b32.xlu0 %v1233_v19, %s3849_s26  ;;  %v3348_v20 = vpop.f32.mrb[9].mxu1 }
 0x8f9   :  { %v1063_v23 = vpop.xlane.xlu0 %1062 }
 0x8fa   :  { %v1064_v24 = vsub.f32 %v1060_v16, %v1063_v23  ;;  %1247 = vrot.lane.b32.xlu0 %v1233_v19, %s3851_s28 }
 0x8fc   :  { %v1065_v25 = vmul.f32 1.442695, %v1064_v24 }
 0x8fd   :  { %v3721_v26 = vpop.permute.xlu0 %3720 }
 0x8fe   :  { %3782 = vpow2.f32 %v1065_v25  ;;  %v3723_v29 = vunpack.i.h.bf16 %v3721_v26  ;;  %v3722_v31 = vunpack.i.l.bf16 %v3721_v26  ;;  %1253 = vrot.lane.b32.xlu0 %v1233_v19, %s3853_s30 }
 0x900   :  { %v3552_v32 = vpack.c.bf16 %v3723_v29, %v3722_v31  ;;  %v29_v29 = vld [vmem:[%s4544_s3 + $0x18] sm:$0xff] }
 0x901   :  { %v1267_v35 = vpop.permute.xlu0 %1266  ;;  %v31_v31 = vld [vmem:[%s4544_s3 + $0x38] sm:$0xff] }
 0x902   :  { %3553 = vmatpush3.bf16.msra.mxu0 %v3552_v32 }
 0x903   :  { %3558 = vmatprep.subr.bf16.mxu0 %v3844_v6 }
 0x908   :  { %v3783_v46 = vpop.eup %3782 }
 0x909   :  { %v1067_v33 = vsel %vm476_vm12, %v3783_v46, 0.0 }
 0x90a   :  { %1068 = vadd.xlane.f32.xlu1 %v1067_v33 }
 0x91b   :  { %3725 = vrot.lane.b32.xlu1 %v3965_v21, %s3869_s22 }
 0x91f   :  { %1238 = vrot.lane.b32.xlu1 %v1233_v19, %s3850_s27 }
 0x923   :  { %1244 = vrot.lane.b32.xlu1 %v1233_v19, %s3852_s29 }
 0x927   :  { %1250 = vrot.lane.b32.xlu1 %v1233_v19, %s3854_s7 }
 0x92b   :  { %1256 = vrot.lane.b32.xlu1 %v1233_v19, %s3855_s8 }
 0x968   :  { %v1242_v39 = vpop.permute.xlu0 %1241 }
 0x96c   :  { %v1248_v52 = vpop.permute.xlu0 %1247 }
 0x970   :  { %v1254_v59 = vpop.permute.xlu0 %1253 }
 0x997   :  { %v1069_v34 = vpop.xlane.xlu1 %1068 }
 0x998   :  { %3784 = vrcp.f32 %v1069_v34 }
 0x99b   :  { %v3726_v37 = vpop.permute.xlu1 %3725 }
 0x99c   :  { %v3728_v41 = vunpack.i.h.bf16 %v3726_v37  ;;  %v3727_v42 = vunpack.i.l.bf16 %v3726_v37 }
 0x99e   :  { %v3559_v54 = vpack.c.bf16 %v3728_v41, %v3727_v42 }
 0x99f   :  { %v1239_v40 = vpop.permute.xlu1 %1238 }
 0x9a0   :  { %v1259_v44 = vsel %vm374_vm4, %v1233_v19, %v1239_v40 }
 0x9a1   :  { %v1260_v53 = vsel %vm376_vm5, %v1259_v44, %v1242_v39 }
 0x9a2   :  { %v3785_v45 = vpop.eup %3784 }
 0x9a3   :  { %v1071_v36 = vmul.f32 %v3785_v45, %v3783_v46  ;;  %v1245_v48 = vpop.permute.xlu1 %1244 }
 0x9a4   :  { %v1261_v55 = vsel %vm378_vm6, %v1260_v53, %v1245_v48 }
 0x9a5   :  { %3338 = vmatmul.mubr.msk.f32.vlgmr.msra.gmra.mrb[18].mxu0 %vm476_vm12, %v1071_v36  ;;  %v1262_v56 = vsel %vm380_vm7, %v1261_v55, %v1248_v52  ;;  %v4274_v52 = vmul.f32 0.35355338, %v3975_v27 }
 0x9a6   :  { %3561 = vmatpush3.bf16.xpose.msk.msra.mxu0 %vm3989_vm3, %v3559_v54  ;;  %3353 = vmatprep.mubr.msk.f32.mxu0 %vm3845_vm1, %v3846_v8 }
 0x9a7   :  { %v1251_v57 = vpop.permute.xlu1 %1250  ;;  %3562 = vmatprep.subr.bf16.mxu0 %v3844_v6 }
 0x9a8   :  { %v1263_v58 = vsel %vm382_vm8, %v1262_v56, %v1251_v57 }
 0x9a9   :  { %v1264_v61 = vsel %vm384_vm9, %v1263_v58, %v1254_v59 }
 0x9ab   :  { %v1257_v60 = vpop.permute.xlu1 %1256 }
 0x9ac   :  { %v1265_v62 = vsel %vm386_vm10, %v1264_v61, %v1257_v60 }
 0x9ad   :  { %3354 = vmatmul.mubr.msk.f32.vlgmr.msra.gmra.mrb[20].mxu0 %vm272_vm2, %v1267_v35  ;;  %1273 = vrot.lane.b32.xlu0 %v1265_v62, %s3856_s9 }
 0x9ae   :  { %3360 = vmatprep.mubr.msk.f32.mxu0 %vm3845_vm1, %v3846_v8 }
 0xa1f   :  { %v1274_v1 = vpop.permute.xlu0 %1273 }
 0xa78   :  { %v1147_v63 = vpop.f32.mrb[18].mxu0 }
 0xa79   :  { %v3339_v0 = vpop.f32.mrb[19].mxu0 }
 0xa80   :  { %v1348_v2 = vpop.f32.mrb[20].mxu0 }
 0xa81   :  { %v1349_v3 = vadd.f32 %v1348_v2, %v1274_v1  ;;  %v3355_v5 = vpop.f32.mrb[21].mxu0 }
 0xa83   :  { %v1352_v9 = vadd.f32 %v1349_v3, %v4037_v13 }
 0xa85   :  { %v1353_v10 = vsel %vm476_vm12, %v1352_v9, -inf }
 0xa86   :  { %1354 = vmax.xlane.f32.xlu1 %v1353_v10 }
 0xa97   :  { %1444 = vrot.lane.b32.xlu1 %v4169_v38, %s4548_s19 }
 0xa9b   :  { %1448 = vrot.lane.b32.xlu1 %v1147_v63, %s4550_s15 }
 0xb13   :  { %v1355_v11 = vpop.xlane.xlu1 %1354 }
 0xb14   :  { %v1356_v14 = vsub.f32 %v1352_v9, %v1355_v11 }
 0xb16   :  { %v1357_v15 = vmul.f32 1.442695, %v1356_v14 }
 0xb17   :  { %v1445_v37 = vpop.permute.xlu1 %1444 }
 0xb18   :  { %3786 = vpow2.f32 %v1357_v15  ;;  %v1455_v44 = vsel %vm272_vm2, %v4078_v49, %v1445_v37 }
 0xb1b   :  { %v1449_v40 = vpop.permute.xlu1 %1448 }
 0xb1c   :  { %v1456_v45 = vsel %vm476_vm12, %v1455_v44, %v1449_v40 }
 0xb22   :  { %v3787_v16 = vpop.eup %3786 }
 0xb23   :  { %v1359_v18 = vsel %vm476_vm12, %v3787_v16, 0.0 }
 0xb24   :  { %1360 = vadd.xlane.f32.xlu0 %v1359_v18 }
 0xb3a   :  { %3730 = vrot.lane.b32.xlu0 %v3965_v21, %s4551_s23  ;;  %v4226_v21 = vmul.f32 0.35355338, %v3977_v28  ;;  %v30_v28 = vld [vmem:[%s4544_s3 + $0x28] sm:$0xff] }
 0xb3b   :  { %v4248_v32 = vpack.c.bf16 %v31_v31, %v30_v28 }
 0xb3e   :  { %3735 = vrot.lane.b32.xlu0 %v3979_v30, %s3847_s2 }
 0xbb1   :  { %v1361_v19 = vpop.xlane.xlu0 %1360 }
 0xbb2   :  { %3788 = vrcp.f32 %v1361_v19 }
 0xbb5   :  { %v3731_v38 = vpop.permute.xlu0 %3730 }
 0xbb6   :  { %v3733_v20 = vunpack.i.h.bf16 %v3731_v38  ;;  %v3732_v23 = vunpack.i.l.bf16 %v3731_v38 }
 0xbb8   :  { %v3563_v24 = vpack.c.bf16 %v3733_v20, %v3732_v23 }
 0xbb9   :  { %v3736_v39 = vpop.permute.xlu0 %3735 }
 0xbba   :  { %3564 = vmatpush3.bf16.msra.mxu0 %v3563_v24  ;;  %v3738_v41 = vunpack.i.h.bf16 %v3736_v39  ;;  %v3737_v42 = vunpack.i.l.bf16 %v3736_v39 }
 0xbbb   :  { %3571 = vmatprep.subr.bf16.mxu0 %v3844_v6 }
 0xbbc   :  { %v3789_v25 = vpop.eup %3788  ;;  %v3576_v53 = vpack.c.bf16 %v3738_v41, %v3737_v42 }
 0xbbd   :  { %v1363_v26 = vmul.f32 %v3789_v25, %v3787_v16 }
 0xbbf   :  { %3361 = vmatmul.mubr.msk.f32.vlgmr.msra.gmra.mrb[22].mxu0 %vm476_vm12, %v1363_v26 }
 0xbc0   :  { %3380 = vmatprep.mubr.msk.f32.mxu0 %vm3845_vm1, %v3846_v8 }
 0xbc3   :  { %3574 = vmatpush3.bf16.xpose.msk.msra.mxu0 %vm3989_vm3, %v4002_v50  ;;  %v28_v50 = vld [vmem:[%s4544_s3 + $0x8] sm:$0xff] }
 0xbc4   :  { %3378 = vmatprep.subr.mxu0 %v3846_v8 }
 0xbcb   :  { %3379 = vmatpush3.xpose.msk.msra.mxu0 %vm272_vm2, %v4008_v51  ;;  %v4242_v51 = vpack.c.bf16 %v29_v29, %v28_v50 }
 0xbcc   :  { %3579 = vmatprep.subr.bf16.mxu0 %v3844_v6 }
 0xbcd   :  { %3567 = vmatpush3.bf16.msra.mxu1 %v4242_v51 }
 0xbce   :  { %3381 = vmatmul.mubr.msk.f32.vlgmr.msra.gmra.mrb[24].mxu0 %vm272_vm2, %v4226_v21  ;;  %3568 = vmatprep.subr.bf16.mxu1 %v3844_v6 }
 0xbcf   :  { %3394 = vmatprep.mubr.msk.f32.mxu0 %vm3845_vm1, %v3846_v8 }
 0xbd1   :  { %3570 = vmatpush3.bf16.msra.mxu1 %v4248_v32 }
 0xbd2   :  { %3575 = vmatprep.subr.bf16.mxu1 %v3844_v6 }
 0xc92   :  { %v1439_v46 = vpop.f32.mrb[22].mxu0 }
 0xc93   :  { %1452 = vrot.lane.b32.xlu1 %v1439_v46, %s3858_s12  ;;  %v3362_v33 = vpop.f32.mrb[23].mxu0 }
 0xca1   :  { %v1605_v34 = vpop.f32.mrb[24].mxu0 }
 0xca2   :  { %1613 = vrot.lane.b32.xlu1 %v1605_v34, %s3849_s26  ;;  %1610 = vrot.lane.b32.xlu0 %v1605_v34, %s3850_s27  ;;  %v3382_v35 = vpop.f32.mrb[25].mxu0 }
 0xca6   :  { %1619 = vrot.lane.b32.xlu1 %v1605_v34, %s3851_s28  ;;  %1616 = vrot.lane.b32.xlu0 %v1605_v34, %s3852_s29 }
 0xcaa   :  { %1625 = vrot.lane.b32.xlu1 %v1605_v34, %s3853_s30  ;;  %1622 = vrot.lane.b32.xlu0 %v1605_v34, %s3854_s7 }
 0xcae   :  { %1628 = vrot.lane.b32.xlu0 %v1605_v34, %s3855_s8 }
 0xcb2   :  { %1816 = vrot.lane.b32.xlu0 %v4226_v21, %s3861_s14 }
 0xd05   :  { %v1453_v36 = vpop.permute.xlu1 %1452 }
 0xd06   :  { %v1458_v48 = vsel %vm1457_vm13, %v1456_v45, %v1453_v36 }
 0xd07   :  { %3372 = vmatmul.mubr.msk.f32.vlgmr.msra.gmra.mrb[10].mxu1 %vm64_vm0, %v1458_v48 }
 0xd08   :  { %3578 = vmatpush3.bf16.xpose.msk.msra.mxu1 %vm3989_vm3, %v3576_v53  ;;  %3387 = vmatprep.mubr.msk.f32.mxu1 %vm3845_vm1, %v3846_v8 }
 0xd09   :  { %3582 = vmatprep.subr.bf16.mxu1 %v3844_v6 }
 0xd0f   :  { %3388 = vmatmul.mubr.msk.f32.vlgmr.msra.gmra.mrb[12].mxu1 %vm272_vm2, %v4274_v52 }
 0xd10   :  { %3585 = vmatpush3.bf16.xpose.msk.msra.mxu1 %vm3989_vm3, %v4066_v47  ;;  %3403 = vmatprep.mubr.msk.f32.mxu1 %vm3845_vm1, %v3846_v8 }
 0xd11   :  { %3401 = vmatprep.subr.mxu1 %v3846_v8 }
 0xd14   :  { %v1611_v49 = vpop.permute.xlu0 %1610  ;;  %v1614_v54 = vpop.permute.xlu1 %1613 }
 0xd15   :  { %v1631_v55 = vsel %vm374_vm4, %v1605_v34, %v1611_v49 }
 0xd16   :  { %v1632_v56 = vsel %vm376_vm5, %v1631_v55, %v1614_v54 }
 0xd18   :  { %3402 = vmatpush3.xpose.msk.msra.mxu1 %vm272_vm2, %v4047_v22  ;;  %v1617_v27 = vpop.permute.xlu0 %1616  ;;  %v1620_v57 = vpop.permute.xlu1 %1619 }
 0xd19   :  { %v1633_v58 = vsel %vm378_vm6, %v1632_v56, %v1617_v27  ;;  %3593 = vmatprep.subr.bf16.mxu1 %v3844_v6 }
 0xd1a   :  { %v1634_v47 = vsel %vm380_vm7, %v1633_v58, %v1620_v57 }
 0xd1c   :  { %v1623_v59 = vpop.permute.xlu0 %1622  ;;  %v1626_v61 = vpop.permute.xlu1 %1625 }
 0xd1d   :  { %v1635_v60 = vsel %vm382_vm8, %v1634_v47, %v1623_v59 }
 0xd1e   :  { %v1636_v62 = vsel %vm384_vm9, %v1635_v60, %v1626_v61 }
 0xd20   :  { %v1629_v63 = vpop.permute.xlu0 %1628 }
 0xd21   :  { %v1637_v0 = vsel %vm386_vm10, %v1636_v62, %v1629_v63 }
 0xd22   :  { %1645 = vrot.lane.b32.xlu1 %v1637_v0, %s3856_s9 }
 0xd24   :  { %v1817_v22 = vpop.permute.xlu0 %1816 }
 0xd25   :  { %3404 = vmatmul.mubr.msk.f32.vlgmr.msra.gmra.mrb[14].mxu1 %vm272_vm2, %v1817_v22 }
 0xd26   :  { %3596 = vmatpush3.bf16.xpose.msk.msra.mxu1 %vm3989_vm3, %v4101_v12  ;;  %3426 = vmatprep.mubr.msk.f32.mxu1 %vm3845_vm1, %v3846_v8 }
 0xd27   :  { %3424 = vmatprep.subr.mxu1 %v3846_v8 }
 0xd2e   :  { %3425 = vmatpush3.xpose.msk.msra.mxu1 %vm272_vm2, %v4108_v17 }
 0xd2f   :  { %3604 = vmatprep.subr.bf16.mxu1 %v3844_v6 }
 0xd94   :  { %v1646_v3 = vpop.permute.xlu1 %1645 }
 0xdda   :  { %v4305_v1 = vpop.f32.mrb[10].mxu1 }
 0xddb   :  { %v3373_v2 = vpop.f32.mrb[11].mxu1 }
 0xde2   :  { %v1721_v5 = vpop.f32.mrb[12].mxu1 }
 0xde3   :  { %v1722_v9 = vadd.f32 %v1721_v5, %v1646_v3  ;;  %v3389_v10 = vpop.f32.mrb[13].mxu1 }
 0xde5   :  { %v1725_v11 = vadd.f32 %v1722_v9, %v4037_v13 }
 0xde7   :  { %v1726_v12 = vsel %vm476_vm12, %v1725_v11, -inf }
 0xde8   :  { %1727 = vmax.xlane.f32.xlu1 %v1726_v12 }
 0xdf8   :  { %v1886_v14 = vpop.f32.mrb[14].mxu1 }
 0xdf9   :  { %3745 = vrot.lane.b32.xlu1 %v3979_v30, %s3859_s1  ;;  %v3405_v15 = vpop.f32.mrb[15].mxu1 }
 0xdfd   :  { %1919 = vrot.lane.b32.xlu1 %v4274_v52, %s3861_s14 }
 0xe01   :  { %1894 = vrot.lane.b32.xlu1 %v1886_v14, %s3849_s26 }
 0xe05   :  { %1900 = vrot.lane.b32.xlu1 %v1886_v14, %s3851_s28 }
 0xe09   :  { %1906 = vrot.lane.b32.xlu1 %v1886_v14, %s3853_s30 }
 0xe75   :  { %v1728_v17 = vpop.xlane.xlu1 %1727 }
 0xe76   :  { %v1729_v16 = vsub.f32 %v1725_v11, %v1728_v17 }
 0xe78   :  { %v1730_v18 = vmul.f32 1.442695, %v1729_v16 }
 0xe79   :  { %v3746_v20 = vpop.permute.xlu1 %3745 }
 0xe7a   :  { %3790 = vpow2.f32 %v1730_v18  ;;  %v3748_v34 = vunpack.i.h.bf16 %v3746_v20  ;;  %v3747_v35 = vunpack.i.l.bf16 %v3746_v20 }
 0xe7c   :  { %v3587_v44 = vpack.c.bf16 %v3748_v34, %v3747_v35 }
 0xe7d   :  { %v1920_v24 = vpop.permute.xlu1 %1919 }
 0xe81   :  { %v1895_v29 = vpop.permute.xlu1 %1894 }
 0xe84   :  { %v3791_v19 = vpop.eup %3790 }
 0xe85   :  { %v1732_v38 = vsel %vm476_vm12, %v3791_v19, 0.0  ;;  %v1901_v41 = vpop.permute.xlu1 %1900 }
 0xe86   :  { %1733 = vadd.xlane.f32.xlu0 %v1732_v38 }
 0xe89   :  { %v1907_v48 = vpop.permute.xlu1 %1906 }
 0xe9c   :  { %3740 = vrot.lane.b32.xlu0 %v3979_v30, %s3860_s13 }
 0xea0   :  { %1891 = vrot.lane.b32.xlu0 %v1886_v14, %s3850_s27 }
 0xea4   :  { %1897 = vrot.lane.b32.xlu0 %v1886_v14, %s3852_s29 }
 0xea8   :  { %1903 = vrot.lane.b32.xlu0 %v1886_v14, %s3854_s7 }
 0xeac   :  { %1909 = vrot.lane.b32.xlu0 %v1886_v14, %s3855_s8 }
 0xeb0   :  { %2096 = vrot.lane.b32.xlu0 %v4226_v21, %s3863_s16 }
 0xf13   :  { %v1734_v23 = vpop.xlane.xlu0 %1733 }
 0xf14   :  { %3792 = vrcp.f32 %v1734_v23 }
 0xf17   :  { %v3741_v25 = vpop.permute.xlu0 %3740 }
 0xf18   :  { %v3743_v26 = vunpack.i.h.bf16 %v3741_v25  ;;  %v3742_v50 = vunpack.i.l.bf16 %v3741_v25 }
 0xf1a   :  { %v3580_v28 = vpack.c.bf16 %v3743_v26, %v3742_v50 }
 0xf1b   :  { %v1892_v31 = vpop.permute.xlu0 %1891 }
 0xf1c   :  { %v1912_v46 = vsel %vm374_vm4, %v1886_v14, %v1892_v31  ;;  %3581 = vmatpush3.bf16.msra.mxu0 %v3580_v28 }
 0xf1d   :  { %3586 = vmatprep.subr.bf16.mxu0 %v3844_v6  ;;  %v1913_v39 = vsel %vm376_vm5, %v1912_v46, %v1895_v29 }
 0xf1e   :  { %v3793_v33 = vpop.eup %3792 }
 0xf1f   :  { %v1736_v37 = vmul.f32 %v3793_v33, %v3791_v19  ;;  %v1898_v40 = vpop.permute.xlu0 %1897 }
 0xf20   :  { %v1914_v42 = vsel %vm378_vm6, %v1913_v39, %v1898_v40 }
 0xf21   :  { %3395 = vmatmul.mubr.msk.f32.vlgmr.msra.gmra.mrb[26].mxu0 %vm476_vm12, %v1736_v37  ;;  %v1915_v45 = vsel %vm380_vm7, %v1914_v42, %v1901_v41 }
 0xf22   :  { %3410 = vmatprep.mubr.msk.f32.mxu0 %vm3845_vm1, %v3846_v8 }
 0xf23   :  { %v1904_v36 = vpop.permute.xlu0 %1903 }
 0xf24   :  { %v1916_v53 = vsel %vm382_vm8, %v1915_v45, %v1904_v36 }
 0xf25   :  { %3589 = vmatpush3.bf16.xpose.msk.msra.mxu0 %vm3989_vm3, %v3587_v44  ;;  %v1917_v54 = vsel %vm384_vm9, %v1916_v53, %v1907_v48 }
 0xf26   :  { %3590 = vmatprep.subr.bf16.mxu0 %v3844_v6 }
 0xf27   :  { %v1910_v49 = vpop.permute.xlu0 %1909 }
 0xf28   :  { %v1918_v55 = vsel %vm386_vm10, %v1917_v54, %v1910_v49 }
 0xf29   :  { %1926 = vrot.lane.b32.xlu1 %v1918_v55, %s3856_s9 }
 0xf2b   :  { %v2097_v56 = vpop.permute.xlu0 %2096 }
 0xf2c   :  { %3411 = vmatmul.mubr.msk.f32.vlgmr.msra.gmra.mrb[28].mxu0 %vm272_vm2, %v1920_v24  ;;  %3427 = vmatmul.mubr.msk.f32.vlgmr.msra.gmra.mrb[16].mxu1 %vm272_vm2, %v2097_v56 }
 0xf2d   :  { %3607 = vmatpush3.bf16.xpose.msk.msra.mxu1 %vm3989_vm3, %v4155_v4  ;;  %3417 = vmatprep.mubr.msk.f32.mxu0 %vm3845_vm1, %v3846_v8 }
 0xf2e   :  { %3447 = vmatprep.subr.mxu1 %v3846_v8  ;;  %3449 = vmatprep.mubr.msk.f32.mxu1 %vm3845_vm1, %v3846_v8 }
 0xf35   :  { %3448 = vmatpush3.xpose.msk.msra.mxu1 %vm272_vm2, %v4161_v7 }
 0xf36   :  { %3615 = vmatprep.subr.bf16.mxu1 %v3844_v6 }
 0xf9b   :  { %v1927_v58 = vpop.permute.xlu1 %1926 }
 0xff4   :  { %v4353_v27 = vpop.f32.mrb[26].mxu0 }
 0xff5   :  { %v3396_v57 = vpop.f32.mrb[27].mxu0 }
 0xfff   :  { %v2001_v47 = vpop.f32.mrb[28].mxu0  ;;  %v2166_v59 = vpop.f32.mrb[16].mxu1 }
0x1000   :  { %v2002_v4 = vadd.f32 %v2001_v47, %v1927_v58  ;;  %v3412_v60 = vpop.f32.mrb[29].mxu0  ;;  %v3428_v61 = vpop.f32.mrb[17].mxu1 }
0x1002   :  { %v2005_v62 = vadd.f32 %v2002_v4, %v4037_v13 }
0x1004   :  { %v2006_v63 = vsel %vm476_vm12, %v2005_v62, -inf }
0x1005   :  { %2007 = vmax.xlane.f32.xlu1 %v2006_v63 }
0x1016   :  { %3755 = vrot.lane.b32.xlu1 %v3979_v30, %s3865_s18 }
0x101a   :  { %2199 = vrot.lane.b32.xlu1 %v4274_v52, %s3863_s16 }
0x101e   :  { %2174 = vrot.lane.b32.xlu1 %v2166_v59, %s3849_s26 }
0x1022   :  { %2180 = vrot.lane.b32.xlu1 %v2166_v59, %s3851_s28 }
0x1026   :  { %2186 = vrot.lane.b32.xlu1 %v2166_v59, %s3853_s30 }
0x1092   :  { %v2008_v7 = vpop.xlane.xlu1 %2007 }
0x1093   :  { %v2009_v0 = vsub.f32 %v2005_v62, %v2008_v7 }
0x1095   :  { %v2010_v22 = vmul.f32 1.442695, %v2009_v0 }
0x1096   :  { %v3756_v5 = vpop.permute.xlu1 %3755 }
0x1097   :  { %3794 = vpow2.f32 %v2010_v22  ;;  %v3758_v38 = vunpack.i.h.bf16 %v3756_v5  ;;  %v3757_v20 = vunpack.i.l.bf16 %v3756_v5 }
0x1099   :  { %v3598_v50 = vpack.c.bf16 %v3758_v38, %v3757_v20 }
0x109a   :  { %v2200_v10 = vpop.permute.xlu1 %2199 }
0x109e   :  { %v2175_v15 = vpop.permute.xlu1 %2174 }
0x10a1   :  { %v3795_v2 = vpop.eup %3794 }
0x10a2   :  { %v2012_v3 = vsel %vm476_vm12, %v3795_v2, 0.0  ;;  %v2181_v25 = vpop.permute.xlu1 %2180 }
0x10a3   :  { %2013 = vadd.xlane.f32.xlu0 %v2012_v3 }
0x10a6   :  { %v2187_v46 = vpop.permute.xlu1 %2186 }
0x10b9   :  { %3750 = vrot.lane.b32.xlu0 %v3979_v30, %s3864_s17 }
0x10bd   :  { %2171 = vrot.lane.b32.xlu0 %v2166_v59, %s3850_s27 }
0x10c1   :  { %2177 = vrot.lane.b32.xlu0 %v2166_v59, %s3852_s29 }
0x10c5   :  { %2183 = vrot.lane.b32.xlu0 %v2166_v59, %s3854_s7 }
0x10c9   :  { %2189 = vrot.lane.b32.xlu0 %v2166_v59, %s3855_s8 }
0x10cd   :  { %2376 = vrot.lane.b32.xlu0 %v4226_v21, %s3867_s20 }
0x1130   :  { %v2014_v9 = vpop.xlane.xlu0 %2013 }
0x1131   :  { %3796 = vrcp.f32 %v2014_v9 }
0x1134   :  { %v3751_v11 = vpop.permute.xlu0 %3750 }
0x1135   :  { %v3753_v12 = vunpack.i.h.bf16 %v3751_v11  ;;  %v3752_v14 = vunpack.i.l.bf16 %v3751_v11 }
0x1137   :  { %v3591_v17 = vpack.c.bf16 %v3753_v12, %v3752_v14 }
0x1138   :  { %v2172_v16 = vpop.permute.xlu0 %2171 }
0x1139   :  { %v2192_v18 = vsel %vm374_vm4, %v2166_v59, %v2172_v16  ;;  %3592 = vmatpush3.bf16.msra.mxu0 %v3591_v17 }
0x113a   :  { %3597 = vmatprep.subr.bf16.mxu0 %v3844_v6  ;;  %v2193_v21 = vsel %vm376_vm5, %v2192_v18, %v2175_v15 }
0x113b   :  { %v3797_v19 = vpop.eup %3796 }
0x113c   :  { %v2016_v23 = vmul.f32 %v3797_v19, %v3795_v2  ;;  %v2178_v24 = vpop.permute.xlu0 %2177 }
0x113d   :  { %v2194_v26 = vsel %vm378_vm6, %v2193_v21, %v2178_v24 }
0x113e   :  { %3418 = vmatmul.mubr.msk.f32.vlgmr.msra.gmra.mrb[30].mxu0 %vm476_vm12, %v2016_v23  ;;  %v2195_v29 = vsel %vm380_vm7, %v2194_v26, %v2181_v25 }
0x113f   :  { %3433 = vmatprep.mubr.msk.f32.mxu0 %vm3845_vm1, %v3846_v8 }
0x1140   :  { %v2184_v28 = vpop.permute.xlu0 %2183 }
0x1141   :  { %v2196_v31 = vsel %vm382_vm8, %v2195_v29, %v2184_v28 }
0x1142   :  { %3600 = vmatpush3.bf16.xpose.msk.msra.mxu0 %vm3989_vm3, %v3598_v50  ;;  %v2197_v33 = vsel %vm384_vm9, %v2196_v31, %v2187_v46  ;;  %v3818_v50 = vld [vmem:[%s4541_s0 + $0x8] sm:$0xff] }
0x1143   :  { %3601 = vmatprep.subr.bf16.mxu0 %v3844_v6 }
0x1144   :  { %v2190_v34 = vpop.permute.xlu0 %2189 }
0x1145   :  { %v2198_v35 = vsel %vm386_vm10, %v2197_v33, %v2190_v34 }
0x1146   :  { %2206 = vrot.lane.b32.xlu1 %v2198_v35, %s3856_s9 }
0x1148   :  { %v2377_v37 = vpop.permute.xlu0 %2376 }
0x1149   :  { %3434 = vmatmul.mubr.msk.f32.vlgmr.msra.gmra.mrb[32].mxu0 %vm272_vm2, %v2200_v10  ;;  %3450 = vmatmul.mubr.msk.f32.vlgmr.msra.gmra.mrb[18].mxu1 %vm272_vm2, %v2377_v37 }
0x114a   :  { %3440 = vmatprep.mubr.msk.f32.mxu0 %vm3845_vm1, %v3846_v8  ;;  %3617 = vmatpush3.bf16.msra.mxu1 %v4242_v51 }
0x114b   :  { %3618 = vmatprep.subr.bf16.mxu1 %v3844_v6  ;;  %3474 = vmatprep.mubr.msk.f32.mxu1 %vm3845_vm1, %v3846_v8 }
0x114e   :  { %3620 = vmatpush3.bf16.msra.mxu1 %v4248_v32 }
0x11b8   :  { %v2207_v41 = vpop.permute.xlu1 %2206 }
0x1211   :  { %v4397_v39 = vpop.f32.mrb[30].mxu0 }
0x1212   :  { %v3419_v40 = vpop.f32.mrb[31].mxu0 }
0x121c   :  { %v2281_v42 = vpop.f32.mrb[32].mxu0  ;;  %v2446_v44 = vpop.f32.mrb[18].mxu1 }
0x121d   :  { %v2282_v45 = vadd.f32 %v2281_v42, %v2207_v41  ;;  %v3435_v36 = vpop.f32.mrb[33].mxu0  ;;  %v3451_v53 = vpop.f32.mrb[19].mxu1 }
0x121f   :  { %v2285_v48 = vadd.f32 %v2282_v45, %v4037_v13 }
0x1221   :  { %v2286_v51 = vsel %vm476_vm12, %v2285_v48, -inf }
0x1222   :  { %2287 = vmax.xlane.f32.xlu1 %v2286_v51 }
0x1233   :  { %3765 = vrot.lane.b32.xlu1 %v3979_v30, %s3869_s22 }
0x1237   :  { %2479 = vrot.lane.b32.xlu1 %v4274_v52, %s3867_s20 }
0x123b   :  { %2454 = vrot.lane.b32.xlu1 %v2446_v44, %s3849_s26  ;;  %s4554_s26 = smov 40  }
0x123f   :  { %2460 = vrot.lane.b32.xlu1 %v2446_v44, %s3851_s28 }
0x1243   :  { %2466 = vrot.lane.b32.xlu1 %v2446_v44, %s3853_s30 }
0x12af   :  { %v2288_v32 = vpop.xlane.xlu1 %2287 }
0x12b0   :  { %v2289_v49 = vsub.f32 %v2285_v48, %v2288_v32 }
0x12b2   :  { %v2290_v54 = vmul.f32 1.442695, %v2289_v49 }
0x12b3   :  { %v3766_v52 = vpop.permute.xlu1 %3765 }
0x12b4   :  { %3798 = vpow2.f32 %v2290_v54  ;;  %v3768_v0 = vunpack.i.h.bf16 %v3766_v52  ;;  %v3767_v22 = vunpack.i.l.bf16 %v3766_v52  ;;  %v3110_v52 = vld [vmem:[%s4546_s5 + $0x3] ss:$0 sm:$0xff] }
0x12b6   :  { %v3609_v11 = vpack.c.bf16 %v3768_v0, %v3767_v22 }
0x12b7   :  { %v2480_v58 = vpop.permute.xlu1 %2479 }
0x12bb   :  { %v2455_v60 = vpop.permute.xlu1 %2454 }
0x12be   :  { %v3799_v55 = vpop.eup %3798 }
0x12bf   :  { %v2292_v56 = vsel %vm476_vm12, %v3799_v55, 0.0  ;;  %v2461_v9 = vpop.permute.xlu1 %2460 }
0x12c0   :  { %2293 = vadd.xlane.f32.xlu0 %v2292_v56 }
0x12c3   :  { %v2467_v17 = vpop.permute.xlu1 %2466 }
0x12d6   :  { %3760 = vrot.lane.b32.xlu0 %v3979_v30, %s3868_s21 }
0x12da   :  { %2451 = vrot.lane.b32.xlu0 %v2446_v44, %s3850_s27  ;;  %s4555_s27 = smov 16  }
0x12de   :  { %2457 = vrot.lane.b32.xlu0 %v2446_v44, %s3852_s29 }
0x12e2   :  { %2463 = vrot.lane.b32.xlu0 %v2446_v44, %s3854_s7 }
0x12e6   :  { %2469 = vrot.lane.b32.xlu0 %v2446_v44, %s3855_s8 }
0x134d   :  { %v2294_v57 = vpop.xlane.xlu0 %2293 }
0x134e   :  { %3800 = vrcp.f32 %v2294_v57 }
0x1351   :  { %v3761_v47 = vpop.permute.xlu0 %3760 }
0x1352   :  { %v3763_v59 = vunpack.i.h.bf16 %v3761_v47  ;;  %v3762_v4 = vunpack.i.l.bf16 %v3761_v47 }
0x1354   :  { %v3602_v61 = vpack.c.bf16 %v3763_v59, %v3762_v4 }
0x1355   :  { %v2452_v62 = vpop.permute.xlu0 %2451 }
0x1356   :  { %v2472_v63 = vsel %vm374_vm4, %v2446_v44, %v2452_v62  ;;  %3603 = vmatpush3.bf16.msra.mxu0 %v3602_v61 }
0x1357   :  { %3608 = vmatprep.subr.bf16.mxu0 %v3844_v6  ;;  %v2473_v3 = vsel %vm376_vm5, %v2472_v63, %v2455_v60 }
0x1358   :  { %v3801_v7 = vpop.eup %3800 }
0x1359   :  { %v2296_v2 = vmul.f32 %v3801_v7, %v3799_v55  ;;  %v2458_v5 = vpop.permute.xlu0 %2457 }
0x135a   :  { %v2474_v10 = vsel %vm378_vm6, %v2473_v3, %v2458_v5 }
0x135b   :  { %3441 = vmatmul.mubr.msk.f32.vlgmr.msra.gmra.mrb[34].mxu0 %vm476_vm12, %v2296_v2  ;;  %v2475_v12 = vsel %vm380_vm7, %v2474_v10, %v2461_v9  ;;  %v3819_v2 = vld [vmem:[%s4541_s0 + $0x18] sm:$0xff]  ;;  %s3871_s0 = smov [#allocation2]  }
0x135c   :  { %3456 = vmatprep.mubr.msk.f32.mxu0 %vm3845_vm1, %v3846_v8  ;;  %s3023_s19 = sshll.u32 %s3871_s0, 4  ;;  %s3024_s19 = int_to_ptr.vmem [resolvable:$true] %s3023_s19 }
0x135d   :  { %v2464_v14 = vpop.permute.xlu0 %2463  ;;  %s3820_s20 = scalar_lea.vmem %s3024_s19, 256  ;;  %p3825_p1 = scmp.lt.s32.totalorder %s3024_s19, %s3024_s19 }
0x135e   :  { %v2476_v15 = vsel %vm382_vm8, %v2475_v12, %v2464_v14  ;;  %v34_v14 = vld [vmem:[%s4545_s4] sm:$0xff]  ;;  %p3821_p0 = scmp.ne.s32.totalorder %s3024_s19, %s3820_s20  ;;  %p3826_p2 = scmp.lt.s32.totalorder %s3820_s20, %s3820_s20 }
0x135f   :  { %3611 = vmatpush3.bf16.xpose.msk.msra.mxu0 %vm3989_vm3, %v3609_v11  ;;  %v2477_v16 = vsel %vm384_vm9, %v2476_v15, %v2467_v17  ;;  %v35_v15 = vld [vmem:[%s4545_s4 + $0x8] sm:$0xff] }
0x1360   :  { %3612 = vmatprep.subr.bf16.mxu0 %v3844_v6  ;;  %v3621_v17 = vpack.c.bf16 %v35_v15, %v34_v14  ;;  %p3827_p3 = por %p3826_p2, %p3825_p1 }
0x1361   :  { %v2470_v18 = vpop.permute.xlu0 %2469 }
0x1362   :  { %v2478_v19 = vsel %vm386_vm10, %v2477_v16, %v2470_v18  ;;  %v36_v16 = vld [vmem:[%s4545_s4 + $0x10] sm:$0xff]  ;;  %v37_v18 = vld [vmem:[%s4545_s4 + $0x18] sm:$0xff]  ;;  %p3828_p4 = pnand %p3827_p3, %p3821_p0 }
0x1363   :  { %2486 = vrot.lane.b32.xlu1 %v2478_v19, %s3856_s9  ;;  %v3625_v19 = vpack.c.bf16 %v37_v18, %v36_v16 }
0x1366   :  { %3457 = vmatmul.mubr.msk.f32.vlgmr.msra.gmra.mrb[36].mxu0 %vm272_vm2, %v2480_v58 }
0x1367   :  { %3463 = vmatprep.mubr.msk.f32.mxu0 %vm3845_vm1, %v3846_v8  ;;  %v33_v8 = vld [vmem:[%s4544_s3 + $0x48] ss:$0 sm:$0xff]  ;;  %s4556_s3 = smov 8  }
0x1368   :  { %v2744_v26 = vadd.f32 %v4305_v1, %v33_v8 }
0x136a   :  { %v2746_v29 = vadd.f32 %v3818_v50, %v2744_v26  ;;  %v41_v50 = vld [vmem:[%s4545_s4 + $0x38] sm:$0xff] }
0x13d5   :  { %v2487_v23 = vpop.permute.xlu1 %2486 }
0x142e   :  { %v2372_v38 = vpop.f32.mrb[34].mxu0 }
0x142f   :  { %v3442_v20 = vpop.f32.mrb[35].mxu0 }
0x1439   :  { %v2561_v43 = vpop.f32.mrb[36].mxu0 }
0x143a   :  { %v2562_v21 = vadd.f32 %v2561_v43, %v2487_v23  ;;  %v3458_v24 = vpop.f32.mrb[37].mxu0 }
0x143c   :  { %v2565_v6 = vadd.f32 %v2562_v21, %v4037_v13  ;;  %v2748_v13 = vsel %vm64_vm0, %v2746_v29, 0.0 }
0x143e   :  { %v2566_v25 = vsel %vm476_vm12, %v2565_v6, -inf }
0x143f   :  { %2567 = vmax.xlane.f32.xlu0 %v2566_v25  ;;  %v39_v25 = vld [vmem:[%s4545_s4 + $0x28] sm:$0xff] }
0x1455   :  { %3770 = vrot.lane.b32.xlu0 %v3979_v30, %s4554_s26 }
0x1459   :  { %2661 = vrot.lane.b32.xlu0 %v2372_v38, %s4555_s27 }
0x1478   :  { %2749 = vadd.xlane.f32.xlu0 %v2748_v13 }
0x14cc   :  { %v2568_v28 = vpop.xlane.xlu0 %2567 }
0x14cd   :  { %v2569_v31 = vsub.f32 %v2565_v6, %v2568_v28  ;;  %v43_v28 = vld [vmem:[%s4545_s4 + $0x48] sm:$0xff] }
0x14cf   :  { %v2570_v46 = vmul.f32 1.442695, %v2569_v31  ;;  %v44_v31 = vld [vmem:[%s4545_s4 + $0x50] sm:$0xff] }
0x14d0   :  { %v3771_v30 = vpop.permute.xlu0 %3770 }
0x14d1   :  { %3802 = vpow2.f32 %v2570_v46  ;;  %v3773_v33 = vunpack.i.h.bf16 %v3771_v30  ;;  %v3772_v34 = vunpack.i.l.bf16 %v3771_v30  ;;  %v3637_v46 = vpack.c.bf16 %v44_v31, %v43_v28  ;;  %v45_v30 = vld [vmem:[%s4545_s4 + $0x58] sm:$0xff] }
0x14d3   :  { %v3613_v35 = vpack.c.bf16 %v3773_v33, %v3772_v34  ;;  %v46_v33 = vld [vmem:[%s4545_s4 + $0x60] sm:$0xff] }
0x14d4   :  { %v2662_v40 = vpop.permute.xlu0 %2661  ;;  %v3641_v34 = vpack.c.bf16 %v46_v33, %v45_v30 }
0x14d5   :  { %3614 = vmatpush3.bf16.msra.mxu0 %v3613_v35  ;;  %v3111_v35 = vld [vmem:[%s4545_s4 + $0x20] ss:$0 sm:$0xff] }
0x14d6   :  { %3622 = vmatprep.subr.bf16.mxu0 %v3621_v17 }
0x14db   :  { %v3803_v37 = vpop.eup %3802 }
0x14dc   :  { %v2572_v1 = vsel %vm476_vm12, %v3803_v37, 0.0 }
0x14dd   :  { %2573 = vadd.xlane.f32.xlu1 %v2572_v1 }
0x14ee   :  { %2657 = vrot.lane.b32.xlu1 %v4397_v39, %s4556_s3  ;;  %v3109_v39 = vld [vmem:[%s4546_s5 + $0x2] ss:$0 sm:$0xff] }
0x1505   :  { %v2750_v41 = vpop.xlane.xlu0 %2749 }
0x1506   :  { %v2755_v42 = vmul.f32 0.03125, %v2750_v41 }
0x1508   :  { %v2757_v44 = vsub.f32 %v2746_v29, %v2755_v42  ;;  %v42_v29 = vld [vmem:[%s4545_s4 + $0x40] sm:$0xff] }
0x1509   :  { %v3633_v13 = vpack.c.bf16 %v42_v29, %v41_v50 }
0x150a   :  { %v2759_v45 = vmul.f32 %v2757_v44, %v2757_v44 }
0x150c   :  { %v2761_v36 = vsel %vm64_vm0, %v2759_v45, 0.0 }
0x150d   :  { %2762 = vadd.xlane.f32.xlu0 %v2761_v36 }
0x156a   :  { %v2574_v53 = vpop.xlane.xlu1 %2573 }
0x156b   :  { %3804 = vrcp.f32 %v2574_v53 }
0x156e   :  { %v2658_v4 = vpop.permute.xlu1 %2657 }
0x156f   :  { %v2668_v60 = vsel %vm272_vm2, %v4353_v27, %v2658_v4 }
0x1570   :  { %v2669_v61 = vsel %vm476_vm12, %v2668_v60, %v2662_v40  ;;  %v3114_v60 = vld [vmem:[%s4546_s5 + $0x6] ss:$0 sm:$0xff] }
0x1575   :  { %v3805_v48 = vpop.eup %3804 }
0x1576   :  { %v2576_v51 = vmul.f32 %v3805_v48, %v3803_v37 }
0x1578   :  { %3464 = vmatmul.mubr.msk.f32.vlgmr.msra.gmra.mrb[38].mxu0 %vm476_vm12, %v2576_v51 }
0x1579   :  { %3624 = vmatpush3.bf16.msra.mxu0 %v3621_v17 }
0x157a   :  { %3626 = vmatprep.subr.bf16.mxu0 %v3625_v19 }
0x157d   :  { %3628 = vmatpush3.bf16.msra.mxu0 %v3625_v19 }
0x159a   :  { %v2763_v32 = vpop.xlane.xlu0 %2762 }
0x159b   :  { %v2767_v49 = vmul.f32 0.03125, %v2763_v32 }
0x159d   :  { %v2769_v54 = vadd.f32 1e-05, %v2767_v49 }
0x159f   :  { %3806 = vrsqrt.f32 %v2769_v54 }
0x15a9   :  { %v3807_v55 = vpop.eup %3806 }
0x15aa   :  { %v2773_v56 = vmul.f32 %v3807_v55, %v2757_v44 }
0x15ac   :  { %v2779_v57 = vmul.f32 %v3109_v39, %v2773_v56 }
0x15ae   :  { %v4457_v58 = vadd.f32 %v3110_v52, %v2779_v57 }
0x15b0   :  { %3485 = vmatprep.mubr.msk.f32.mxu0 %vm64_vm0, %v4457_v58 }
0x164b   :  { %v2652_v47 = vpop.f32.mrb[38].mxu0 }
0x164c   :  { %2665 = vrot.lane.b32.xlu1 %v2652_v47, %s3858_s12  ;;  %v3465_v59 = vpop.f32.mrb[39].mxu0 }
0x16be   :  { %v2666_v62 = vpop.permute.xlu1 %2665 }
0x16bf   :  { %v2670_v63 = vsel %vm1457_vm13, %v2669_v61, %v2666_v62 }
0x16c0   :  { %3475 = vmatmul.mubr.msk.f32.vlgmr.msra.gmra.mrb[20].mxu1 %vm64_vm0, %v2670_v63 }
0x1793   :  { %v2740_v7 = vpop.f32.mrb[20].mxu1 }
0x1794   :  { %v2745_v0 = vadd.f32 %v2740_v7, %v33_v8  ;;  %v3476_v22 = vpop.f32.mrb[21].mxu1  ;;  %v40_v8 = vld [vmem:[%s4545_s4 + $0x30] sm:$0xff] }
0x1795   :  { %v3629_v26 = vpack.c.bf16 %v40_v8, %v39_v25  ;;  %v3118_v8 = vld [vmem:[%s4546_s5 + $0x5] ss:$0 sm:$0xff] }
0x1796   :  { %v2747_v3 = vadd.f32 %v3819_v2, %v2745_v0 }
0x1797   :  { %3630 = vmatprep.subr.bf16.mxu1 %v3629_v26 }
0x1798   :  { %v2751_v5 = vsel %vm64_vm0, %v2747_v3, 0.0  ;;  %3632 = vmatpush3.bf16.msra.mxu1 %v3629_v26 }
0x1799   :  { %2752 = vadd.xlane.f32.xlu1 %v2751_v5  ;;  %3634 = vmatprep.subr.bf16.mxu1 %v3633_v13 }
0x179c   :  { %3636 = vmatpush3.bf16.msra.mxu1 %v3633_v13 }
0x179d   :  { %3638 = vmatprep.subr.bf16.mxu1 %v3637_v46 }
0x17a0   :  { %3640 = vmatpush3.bf16.msra.mxu1 %v3637_v46 }
0x17a1   :  { %3642 = vmatprep.subr.bf16.mxu1 %v3641_v34 }
0x17a4   :  { %3644 = vmatpush3.bf16.msra.mxu1 %v3641_v34 }
0x1826   :  { %v2753_v9 = vpop.xlane.xlu1 %2752 }
0x1827   :  { %v2756_v27 = vmul.f32 0.03125, %v2753_v9 }
0x1829   :  { %v2758_v10 = vsub.f32 %v2747_v3, %v2756_v27 }
0x182b   :  { %v2760_v11 = vmul.f32 %v2758_v10, %v2758_v10 }
0x182d   :  { %v2764_v12 = vsel %vm64_vm0, %v2760_v11, 0.0 }
0x182e   :  { %2765 = vadd.xlane.f32.xlu0 %v2764_v12 }
0x18bb   :  { %v2766_v38 = vpop.xlane.xlu0 %2765 }
0x18bc   :  { %v2768_v20 = vmul.f32 0.03125, %v2766_v38 }
0x18be   :  { %v2770_v23 = vadd.f32 1e-05, %v2768_v20 }
0x18c0   :  { %3808 = vrsqrt.f32 %v2770_v23 }
0x18ca   :  { %v3809_v43 = vpop.eup %3808 }
0x18cb   :  { %v2774_v21 = vmul.f32 %v3809_v43, %v2758_v10 }
0x18cd   :  { %v2780_v24 = vmul.f32 %v3109_v39, %v2774_v21  ;;  %v3117_v21 = vld [vmem:[%s4546_s5 + $0x4] ss:$0 sm:$0xff] }
0x18cf   :  { %v2786_v6 = vadd.f32 %v3110_v52, %v2780_v24 }
0x18d1   :  { %3486 = vmatmul.mubr.msk.f32.vlgmr.msra.gmra.mrb[40].mxu0 %vm64_vm0, %v2786_v6 }
0x19a4   :  { %v3487_v37 = vpop.f32.mrb[40].mxu0 }
0x19a5   :  { %v2869_v1 = vadd.f32 %v3487_v37, %v3111_v35  ;;  %v2863_v40 = vpop.f32.mrb[41].mxu0 }
0x19a6   :  { %v2864_v41 = vadd.f32 %v3111_v35, %v2863_v40 }
0x19a7   :  { %v2873_v42 = vmul.f32 %v2869_v1, %v2869_v1 }
0x19a8   :  { %v2872_v44 = vmul.f32 %v2864_v41, %v2864_v41 }
0x19a9   :  { %v2875_v45 = vmul.f32 %v2873_v42, %v2869_v1 }
0x19aa   :  { %v2874_v36 = vmul.f32 %v2872_v44, %v2864_v41 }
0x19ab   :  { %v2877_v53 = vmul.f32 0.044715, %v2875_v45 }
0x19ac   :  { %v2876_v48 = vmul.f32 0.044715, %v2874_v36 }
0x19ad   :  { %v2879_v51 = vadd.f32 %v2877_v53, %v2869_v1 }
0x19ae   :  { %v2878_v32 = vadd.f32 %v2876_v48, %v2864_v41 }
0x19af   :  { %v2881_v49 = vmul.f32 0.7978846, %v2879_v51 }
0x19b0   :  { %v2880_v54 = vmul.f32 0.7978846, %v2878_v32 }
0x19b1   :  { %3810 = vtanh.f32 %v2881_v49 }
0x19b2   :  { %3812 = vtanh.f32 %v2880_v54 }
0x19bb   :  { %v3811_v55 = vpop.eup %3810 }
0x19bc   :  { %v3813_v39 = vpop.eup %3812  ;;  %v2885_v56 = vadd.f32 1.0, %v3811_v55 }
0x19bd   :  { %v2884_v52 = vadd.f32 1.0, %v3813_v39 }
0x19be   :  { %v2887_v57 = vmul.f32 0.5, %v2885_v56 }
0x19bf   :  { %v2886_v47 = vmul.f32 0.5, %v2884_v52 }
0x19c0   :  { %v2889_v4 = vmul.f32 %v2887_v57, %v2869_v1 }
0x19c1   :  { %v2888_v59 = vmul.f32 %v2886_v47, %v2864_v41 }
0x19c3   :  { %3504 = vmatprep.mubr.msk.f32.mxu1 %vm2894_vm14, %v2888_v59 }
0x19c4   :  { %3505 = vmatmul.mubr.msk.f32.vlgmr.msra.gmra.mrb[22].mxu1 %vm2894_vm14, %v2889_v4 }
0x1a97   :  { %v3506_v61 = vpop.f32.mrb[22].mxu1 }
0x1a98   :  { %v2973_v62 = vadd.f32 %v3506_v61, %v3114_v60  ;;  %v2967_v63 = vpop.f32.mrb[23].mxu1 }
0x1a99   :  { %v2968_v7 = vadd.f32 %v3114_v60, %v2967_v63 }
0x1a9a   :  { %v2977_v0 = vadd.f32 %v2973_v62, %v2786_v6 }
0x1a9b   :  { %v2976_v22 = vadd.f32 %v2968_v7, %v4457_v58 }
0x1a9c   :  { %v2981_v2 = vsel %vm64_vm0, %v2977_v0, 0.0 }
0x1a9d   :  { %2982 = vadd.xlane.f32.xlu0 %v2981_v2  ;;  %v2978_v3 = vsel %vm64_vm0, %v2976_v22, 0.0 }
0x1a9e   :  { %2979 = vadd.xlane.f32.xlu1 %v2978_v3 }
0x1b2a   :  { %v2983_v5 = vpop.xlane.xlu0 %2982 }
0x1b2b   :  { %v2985_v9 = vmul.f32 0.03125, %v2983_v5  ;;  %v2980_v27 = vpop.xlane.xlu1 %2979 }
0x1b2c   :  { %v2984_v10 = vmul.f32 0.03125, %v2980_v27 }
0x1b2d   :  { %v2987_v11 = vsub.f32 %v2977_v0, %v2985_v9 }
0x1b2e   :  { %v2986_v12 = vsub.f32 %v2976_v22, %v2984_v10 }
0x1b2f   :  { %v2989_v14 = vmul.f32 %v2987_v11, %v2987_v11 }
0x1b30   :  { %v2988_v15 = vmul.f32 %v2986_v12, %v2986_v12 }
0x1b31   :  { %v2993_v17 = vsel %vm64_vm0, %v2989_v14, 0.0 }
0x1b32   :  { %2994 = vadd.xlane.f32.xlu0 %v2993_v17  ;;  %v2990_v16 = vsel %vm64_vm0, %v2988_v15, 0.0 }
0x1b33   :  { %2991 = vadd.xlane.f32.xlu1 %v2990_v16 }
0x1bbf   :  { %v2995_v58 = vpop.xlane.xlu0 %2994 }
0x1bc0   :  { %v2997_v18 = vmul.f32 0.03125, %v2995_v58  ;;  %v2992_v19 = vpop.xlane.xlu1 %2991 }
0x1bc1   :  { %v2996_v38 = vmul.f32 0.03125, %v2992_v19 }
0x1bc2   :  { %v2999_v20 = vadd.f32 1e-05, %v2997_v18 }
0x1bc3   :  { %v2998_v23 = vadd.f32 1e-05, %v2996_v38 }
0x1bc4   :  { %3814 = vrsqrt.f32 %v2999_v20 }
0x1bc5   :  { %3816 = vrsqrt.f32 %v2998_v23 }
0x1bce   :  { %v3815_v43 = vpop.eup %3814 }
0x1bcf   :  { %v3817_v24 = vpop.eup %3816  ;;  %v3003_v6 = vmul.f32 %v3815_v43, %v2987_v11 }
0x1bd0   :  { %v3002_v25 = vmul.f32 %v3817_v24, %v2986_v12 }
0x1bd1   :  { %v3009_v26 = vmul.f32 %v3117_v21, %v3003_v6 }
0x1bd2   :  { %v3008_v50 = vmul.f32 %v3117_v21, %v3002_v25 }
0x1bd3   :  { %v3015_v29 = vadd.f32 %v3118_v8, %v3009_v26 }
0x1bd4   :  { %v3014_v13 = vadd.f32 %v3118_v8, %v3008_v50 }
0x1bd5   :  { %3017 = vst.msk [vmem:[#allocation2 + $0x8] sm:$0xff] %vm64_vm0, %v3015_v29 }
0x1bd6   :  { %3016 = vst.msk [vmem:[#allocation2] sm:$0xff] %vm64_vm0, %v3014_v13 }
0x1bd7   :  { %3831 = shalt.err (!%p3828_p4)
}
0x1bd8   :  { %s3832_s22 = scalar_lea.hbm %s4547_s6, 256 }
0x1bd9   :  { %p3833_p5 = scmp.ne.s32.totalorder %s4547_s6, %s3832_s22  ;;  %p3836_p6 = scmp.lt.u32.totalorder %s3832_s22, %s4547_s6 }
0x1bdb   :  { %p3838_p7 = pnand %p3836_p6, %p3833_p5 }
0x1bdd   :  { %3841 = shalt.err (!%p3838_p7)
}
0x1bde   :  { %s3872_s10 = smov 128  }
0x1bdf   :  { %3029 = dma.vmem_to_hbm [thread:$0]  %s3024_s19, 256, %s4547_s6, [#allocation3], %s3872_s10, %s3872_s10, %s4556_s3  }
0x1be0   :  { %3842 = dma.done.wait [#allocation3], 256  }
0x1be1   :  { %3843 = vsyncadd [#allocation3], 4294967040 }
0x1be2   :  { %3033 = vsyncpa [#allocation3], 1 }

</bundles_post_ra>
